<compile_context>
chip_gen: v6e
topology: v6e:2x2x1
jax: 0.10.0
libtpu: 0.0.40
codegen_flags: <defaults>
</compile_context>

<pallas_src>
import functools

import jax
import jax.numpy as jnp
from jax.experimental import pallas as pl
from jax.experimental.pallas import tpu as pltpu


# ----------------------------------------------------------------------------
# helpers
# ----------------------------------------------------------------------------
def _round_up(a, b):
    return (a + b - 1) // b * b


def _cdiv(a, b):
    return (a + b - 1) // b


def _act(v, act, slope):
    if act == "relu":
        return jnp.maximum(v, 0.0)
    if act == "lrelu":
        return jnp.where(v >= 0, v, v * slope)
    raise NotImplementedError("wrong")


def _pick_row_tile(h_out, w, cin, stride):
    """Output-row tile TQ with stride*TQ % 8 == 0 and a bounded VMEM patch size."""
    step = 8 if stride == 1 else 4          # guarantees stride*TQ is a multiple of 8
    budget = 4 * 1024 * 1024                # bytes for the (TQ*W, 9*Cin) bf16 patch
    per_row = max(1, w * 9 * cin * 2)
    tq = max(step, min(h_out, budget // per_row))
    tq = max(step, (tq // step) * step)
    d = tq                                  # prefer a tile that divides h_out (no tail)
    while d >= step:
        if h_out % d == 0:
            return d
        d -= step
    return tq


def _pick_hw_tile(hw, c):
    budget = 4 * 1024 * 1024
    t = max(8, min(hw, budget // max(1, c * 4)))
    t = max(8, (t // 8) * 8)
    d = t
    while d >= 8:
        if hw % d == 0:
            return d
        d -= 8
    return t


# ----------------------------------------------------------------------------
# Pallas kernels
# ----------------------------------------------------------------------------
def _conv3x3_kernel(xm_ref, xh_ref, w_ref, b_ref, out_ref, *,
                    stride, tq, w_cols, cin, act, slope):
    # xm_ref : (1, stride*tq, W+2, Cin)  main rows of the zero-padded input (bf16)
    # xh_ref : (1, 8, W+2, Cin)          halo rows immediately below the main block
    # w_ref  : (9*Cin, Cout)             weights, row index = (dy*3+dx)*Cin + c (bf16)
    # b_ref  : (1, Cout)                 bias (f32, zeros when bias=False)
    # out_ref: (1, tq, W, Cout)
    r_in = stride * tq
    x_full = jnp.concatenate([xm_ref[0], xh_ref[0, :2]], axis=0)    # (r_in+2, W+2, Cin)

    taps = []
    for dy in range(3):
        if stride == 1:
            rows = x_full[dy:dy + tq]                               # (tq, W+2, Cin)
        else:
            r = x_full[dy:dy + r_in]                                # (r_in, W+2, Cin)
            # keep every stride-th row (outer-dim reshape only; layout-safe)
            rows = r.reshape(tq, stride, r.shape[1], cin)[:, 0]     # (tq, W+2, Cin)
        for dx in range(3):
            taps.append(rows[:, dx:dx + w_cols, :])                 # (tq, W, Cin)

    patches = jnp.concatenate(taps, axis=-1)                        # (tq, W, 9*Cin)
    acc = jnp.dot(patches.reshape(tq * w_cols, 9 * cin), w_ref[...],
                  preferred_element_type=jnp.float32)               # (tq*W, Cout) f32
    acc = acc.reshape(tq, w_cols, -1) + b_ref[...]
    if act is not None:                                             # fused act (no GN)
        acc = _act(acc, act, slope)
    out_ref[0] = acc.astype(out_ref.dtype)


def _gn_stats_kernel(y_ref, s_ref):
    # y_ref: (1, THW, C)   s_ref: (1, 2, C)  resident accumulator across HW tiles
    @pl.when(pl.program_id(1) == 0)
    def _():
        s_ref[...] = jnp.zeros_like(s_ref)

    v = y_ref[0].astype(jnp.float32)
    s1 = jnp.sum(v, axis=0, keepdims=True)          # (1, C)
    s2 = jnp.sum(v * v, axis=0, keepdims=True)      # (1, C)
    s_ref[0] = s_ref[0] + jnp.concatenate([s1, s2], axis=0)


def _scale_shift_act_kernel(y_ref, sc_ref, sh_ref, o_ref, *, act, slope):
    # y_ref: (1, THW, C)   sc/sh: (1, 1, C)   o_ref: (1, THW, C)
    v = y_ref[0].astype(jnp.float32) * sc_ref[0] + sh_ref[0]
    o_ref[0] = _act(v, act, slope).astype(o_ref.dtype)


# ----------------------------------------------------------------------------
# layer wrappers
# ----------------------------------------------------------------------------
def conv3x3(x_nhwc, w, b, *, stride=1, act=None, slope=0.01, out_dtype=jnp.float32):
    """3x3 conv, pad=1, stride in {1,2}.  x:(B,H,W,Cin), w:(3,3,Cin,Cout), b:(Cout,)|None."""
    B, H, W, Cin = x_nhwc.shape
    Cout = w.shape[-1]
    S = stride
    H_out = (H - 1) // S + 1

    tq = _pick_row_tile(H_out, W, Cin, S)
    n_t = _cdiv(H_out, tq)
    r_in = S * tq
    rows = n_t * r_in + 8                   # main tiles + one 8-row halo block

    xpad = jnp.pad(x_nhwc.astype(jnp.bfloat16),
                   ((0, 0), (1, rows - H - 1), (1, 1), (0, 0)))
    wf = w.reshape(9 * Cin, Cout).astype(jnp.bfloat16)
    bias = jnp.zeros((Cout,), jnp.float32) if b is None else b.astype(jnp.float32)
    bias = bias.reshape(1, Cout)

    halo_fac = r_in // 8
    kern = functools.partial(_conv3x3_kernel, stride=S, tq=tq, w_cols=W,
                             cin=Cin, act=act, slope=slope)
    y = pl.pallas_call(
        kern,
        out_shape=jax.ShapeDtypeStruct((B, n_t * tq, W, Cout), out_dtype),
        grid=(B, n_t),
        in_specs=[
            pl.BlockSpec((1, r_in, W + 2, Cin), lambda bb, t: (bb, t, 0, 0)),
            pl.BlockSpec((1, 8, W + 2, Cin),
                         lambda bb, t: (bb, (t + 1) * halo_fac, 0, 0)),
            pl.BlockSpec((9 * Cin, Cout), lambda bb, t: (0, 0)),
            pl.BlockSpec((1, Cout), lambda bb, t: (0, 0)),
        ],
        out_specs=pl.BlockSpec((1, tq, W, Cout), lambda bb, t: (bb, t, 0, 0)),
        compiler_params=pltpu.CompilerParams(
            dimension_semantics=("parallel", "parallel"),
            vmem_limit_bytes=32 * 1024 * 1024),
    )(xpad, xpad, wf, bias)

    y = y[:, :H_out]
    if S == 2:
        # TODO(synk): fold column decimation into the kernel (even-phase column taps).
        y = y[:, :, ::2, :]
    return y


def group_norm_act(y_nhwc, gamma, beta, *, num_groups, act, slope=0.01, eps=1e-5):
    """GroupNorm (torch semantics) + activation, tiled over H*W."""
    B, H, W, C = y_nhwc.shape
    assert C % num_groups == 0
    Cg = C // num_groups
    HW = H * W
    thw = _pick_hw_tile(HW, C)
    HWp = _round_up(HW, thw)
    n_t = HWp // thw

    yf = y_nhwc.reshape(B, HW, C)
    if HWp != HW:
        yf = jnp.pad(yf, ((0, 0), (0, HWp - HW), (0, 0)))   # zeros: no effect on sums

    stats = pl.pallas_call(
        _gn_stats_kernel,
        out_shape=jax.ShapeDtypeStruct((B, 2, C), jnp.float32),
        grid=(B, n_t),
        in_specs=[pl.BlockSpec((1, thw, C), lambda bb, t: (bb, t, 0))],
        out_specs=pl.BlockSpec((1, 2, C), lambda bb, t: (bb, 0, 0)),
        compiler_params=pltpu.CompilerParams(
            dimension_semantics=("parallel", "arbitrary"),
            vmem_limit_bytes=32 * 1024 * 1024),
    )(yf)

    # tiny (B, 2, C) -> per-channel scale/shift (plain JAX glue on scalars/vectors)
    n = float(HW * Cg)
    s1 = stats[:, 0].reshape(B, num_groups, Cg).sum(-1)     # (B, G)
    s2 = stats[:, 1].reshape(B, num_groups, Cg).sum(-1)     # (B, G)
    mean = s1 / n
    var = jnp.maximum(s2 / n - mean * mean, 0.0)            # biased var (torch GN)
    rstd = jax.lax.rsqrt(var + eps)
    mean_c = jnp.repeat(mean, Cg, axis=-1)                  # (B, C)
    rstd_c = jnp.repeat(rstd, Cg, axis=-1)                  # (B, C)
    scale2 = gamma[None, :] * rstd_c                        # (B, C)
    shift2 = beta[None, :] - mean_c * scale2                # (B, C)
    scale = scale2[:, None, :].astype(jnp.float32)          # (B, 1, C)
    shift = shift2[:, None, :].astype(jnp.float32)          # (B, 1, C)

    kern = functools.partial(_scale_shift_act_kernel, act=act, slope=slope)
    out = pl.pallas_call(
        kern,
        out_shape=jax.ShapeDtypeStruct((B, HWp, C), jnp.float32),
        grid=(B, n_t),
        in_specs=[
            pl.BlockSpec((1, thw, C), lambda bb, t: (bb, t, 0)),
            pl.BlockSpec((1, 1, C), lambda bb, t: (bb, 0, 0)),
            pl.BlockSpec((1, 1, C), lambda bb, t: (bb, 0, 0)),
        ],
        out_specs=pl.BlockSpec((1, thw, C), lambda bb, t: (bb, t, 0)),
        compiler_params=pltpu.CompilerParams(
            dimension_semantics=("parallel", "parallel"),
            vmem_limit_bytes=32 * 1024 * 1024),
    )(yf, scale, shift)

    return out[:, :HW].reshape(B, H, W, C)


def conv_module_forward(x_nchw, params, *, activate="relu", use_gn=False,
                        stride=1, groups_num=1):
    """Forward of the PyTorch CONV module. NCHW in -> NCHW out (float32)."""
    if activate not in ("relu", "lrelu"):
        raise NotImplementedError("wrong")
    x = jnp.transpose(x_nchw, (0, 2, 3, 1)).astype(jnp.float32)     # NHWC
    w, b = params["w"], params["b"]
    if use_gn:
        # keep the intermediate activation in bf16 (halves HBM traffic), stats in f32
        y = conv3x3(x, w, b, stride=stride, act=None, out_dtype=jnp.bfloat16)
        y = group_norm_act(y, params["gamma"], params["beta"],
                           num_groups=groups_num, act=activate)
    else:
        y = conv3x3(x, w, b, stride=stride, act=activate, out_dtype=jnp.float32)
    return jnp.transpose(y, (0, 3, 1, 2))                           # back to NCHW


def init_conv_params(key, cin, cout, *, bias=True, use_gn=False):
    # weight layout here is (kh, kw, Cin, Cout); a PyTorch (Cout, Cin, kh, kw)
    # weight maps to it via w_torch.transpose(2, 3, 1, 0).
    kw, kb = jax.random.split(key)
    std = (2.0 / (9 * cin)) ** 0.5
    return {
        "w": jax.random.normal(kw, (3, 3, cin, cout), jnp.float32) * std,
        "b": (jax.random.normal(kb, (cout,), jnp.float32) * 0.01) if bias else None,
        "gamma": jnp.ones((cout,), jnp.float32) if use_gn else None,
        "beta": jnp.zeros((cout,), jnp.float32) if use_gn else None,
    }


# ----------------------------------------------------------------------------
# Main
# ----------------------------------------------------------------------------
if __name__ == "__main__":
    key = jax.random.PRNGKey(0)
    kx, k1, k2 = jax.random.split(key, 3)

    B, Cin, H, W = 2, 4, 16, 16
    x = jax.random.normal(kx, (B, Cin, H, W), jnp.float32)

    # CONV(4, 32, 'relu', use_Gn=True, stride=1, bias=False, groups_num=4)
    p1 = init_conv_params(k1, Cin, 32, bias=False, use_gn=True)
    fwd1 = jax.jit(functools.partial(conv_module_forward, activate="relu",
                                     use_gn=True, stride=1, groups_num=4))
    y1 = fwd1(x, p1)

    # CONV(32, 64, 'lrelu', use_Gn=False, stride=2, bias=True, groups_num=1)
    p2 = init_conv_params(k2, 32, 64, bias=True, use_gn=False)
    fwd2 = jax.jit(functools.partial(conv_module_forward, activate="lrelu",
                                     use_gn=False, stride=2, groups_num=1))
    y2 = fwd2(y1, p2)

    y1, y2 = jax.block_until_ready((y1, y2))
    assert y1.shape == (B, 32, H, W), y1.shape
    assert y2.shape == (B, 64, H // 2, W // 2), y2.shape
    assert bool(jnp.all(jnp.isfinite(y1))) and bool(jnp.all(jnp.isfinite(y2)))
    print("KERNEL_OK")
</pallas_src>

<mosaic_0001>
module attributes {stable_mosaic.version = 11 : i64} {
  func.func @_gn_stats_kernel(%arg0: i32, %arg1: i32, %arg2: memref<1x256x32xbf16, #tpu.memory_space<vmem>>, %arg3: memref<1x2x32xf32, #tpu.memory_space<vmem>>) attributes {dimension_semantics = [#tpu.dimension_semantics<parallel>, #tpu.dimension_semantics<arbitrary>], iteration_bounds = array<i64: 2, 1>, scalar_prefetch = 0 : i64, scratch_operands = 0 : i64, tpu.core_type = #tpu.core_type<tc>, window_params = [{transform_indices = @transform_0, window_bounds = array<i64: 1, 256, 32>}, {transform_indices = @transform_1, window_bounds = array<i64: 1, 2, 32>}]} {
    %c0_i32 = arith.constant 0 : i32
    %0 = arith.cmpi eq, %arg1, %c0_i32 : i32
    %1 = arith.extui %0 : i1 to i32
    %c0_i32_0 = arith.constant 0 : i32
    %2 = arith.cmpi ne, %1, %c0_i32_0 : i32
    scf.if %2 {
      %cst_10 = arith.constant 0.000000e+00 : f32
      %18 = vector.broadcast %cst_10 : f32 to vector<1x2x32xf32>
      %c0_11 = arith.constant 0 : index
      %c0_12 = arith.constant 0 : index
      %c0_13 = arith.constant 0 : index
      %19 = vector.load %arg3[%c0_11, %c0_12, %c0_13] : memref<1x2x32xf32, #tpu.memory_space<vmem>>, vector<1x2x32xf32>
      tpu.vector_store %arg3[%c0_11, %c0_12, %c0_13], %18 {strides = array<i32>} : memref<1x2x32xf32, #tpu.memory_space<vmem>>, vector<1x2x32xf32>,
    } else {
    }
    %c0 = arith.constant 0 : index
    %c0_1 = arith.constant 0 : index
    %c0_2 = arith.constant 0 : index
    %3 = vector.load %arg2[%c0, %c0_1, %c0_2] : memref<1x256x32xbf16, #tpu.memory_space<vmem>>, vector<1x256x32xbf16>
    %4 = vector.shape_cast %3 : vector<1x256x32xbf16> to vector<256x32xbf16>
    %5 = arith.extf %4 : vector<256x32xbf16> to vector<256x32xf32>
    %cst = arith.constant dense<0.000000e+00> : vector<32xf32>
    %6 = vector.multi_reduction <add>, %5, %cst [0] : vector<256x32xf32> to vector<32xf32>
    %7 = vector.shape_cast %6 : vector<32xf32> to vector<1x32xf32>
    %8 = arith.mulf %5, %5 : vector<256x32xf32>
    %cst_3 = arith.constant dense<0.000000e+00> : vector<32xf32>
    %9 = vector.multi_reduction <add>, %8, %cst_3 [0] : vector<256x32xf32> to vector<32xf32>
    %10 = vector.shape_cast %9 : vector<32xf32> to vector<1x32xf32>
    %c0_4 = arith.constant 0 : index
    %c0_5 = arith.constant 0 : index
    %c0_6 = arith.constant 0 : index
    %11 = vector.load %arg3[%c0_4, %c0_5, %c0_6] : memref<1x2x32xf32, #tpu.memory_space<vmem>>, vector<1x2x32xf32>
    %12 = vector.shape_cast %11 : vector<1x2x32xf32> to vector<2x32xf32>
    %13 = tpu.concatenate %7, %10 in 0 : vector<1x32xf32>, vector<1x32xf32> -> vector<2x32xf32>
    %14 = arith.addf %12, %13 : vector<2x32xf32>
    %c0_7 = arith.constant 0 : index
    %c0_8 = arith.constant 0 : index
    %c0_9 = arith.constant 0 : index
    %15 = vector.load %arg3[%c0_7, %c0_8, %c0_9] : memref<1x2x32xf32, #tpu.memory_space<vmem>>, vector<1x2x32xf32>
    %16 = vector.shape_cast %15 : vector<1x2x32xf32> to vector<2x32xf32>
    %17 = vector.shape_cast %14 : vector<2x32xf32> to vector<1x2x32xf32>
    tpu.vector_store %arg3[%c0_7, %c0_8, %c0_9], %17 {strides = array<i32>} : memref<1x2x32xf32, #tpu.memory_space<vmem>>, vector<1x2x32xf32>,
    return
  }
  func.func @transform_0(%arg0: i32, %arg1: i32) -> (i32, i32, i32) {
    %c0_i32 = arith.constant 0 : i32
    %c0_i32_0 = arith.constant 0 : i32
    return %arg0, %arg1, %c0_i32 : i32, i32, i32
  }
  func.func @transform_1(%arg0: i32, %arg1: i32) -> (i32, i32, i32) {
    %c0_i32 = arith.constant 0 : i32
    %c0_i32_0 = arith.constant 0 : i32
    %c0_i32_1 = arith.constant 0 : i32
    return %arg0, %c0_i32, %c0_i32_0 : i32, i32, i32
  }
}

module attributes {stable_mosaic.version = 11 : i64} {
  func.func @_conv3x3_kernel(%arg0: i32, %arg1: i32, %arg2: memref<1x16x18x4xbf16, #tpu.memory_space<vmem>>, %arg3: memref<1x8x18x4xbf16, #tpu.memory_space<vmem>>, %arg4: memref<36x32xbf16, #tpu.memory_space<vmem>>, %arg5: memref<1x32xf32, #tpu.memory_space<vmem>>, %arg6: memref<1x16x16x32xbf16, #tpu.memory_space<vmem>>) attributes {dimension_semantics = [#tpu.dimension_semantics<parallel>, #tpu.dimension_semantics<parallel>], iteration_bounds = array<i64: 2, 1>, scalar_prefetch = 0 : i64, scratch_operands = 0 : i64, tpu.core_type = #tpu.core_type<tc>, window_params = [{transform_indices = @transform_0, window_bounds = array<i64: 1, 16, 18, 4>}, {transform_indices = @transform_1, window_bounds = array<i64: 1, 8, 18, 4>}, {pipeline_mode = #tpu.pipeline_mode<synchronous>, transform_indices = @transform_2, window_bounds = array<i64: 36, 32>}, {pipeline_mode = #tpu.pipeline_mode<synchronous>, transform_indices = @transform_3, window_bounds = array<i64: 1, 32>}, {transform_indices = @transform_4, window_bounds = array<i64: 1, 16, 16, 32>}]} {
    %c0 = arith.constant 0 : index
    %c0_0 = arith.constant 0 : index
    %c0_1 = arith.constant 0 : index
    %c0_2 = arith.constant 0 : index
    %0 = vector.load %arg2[%c0, %c0_0, %c0_1, %c0_2] : memref<1x16x18x4xbf16, #tpu.memory_space<vmem>>, vector<1x16x18x4xbf16>
    %1 = vector.shape_cast %0 : vector<1x16x18x4xbf16> to vector<16x18x4xbf16>
    %c0_3 = arith.constant 0 : index
    %c0_4 = arith.constant 0 : index
    %c0_5 = arith.constant 0 : index
    %c0_6 = arith.constant 0 : index
    %2 = vector.load %arg3[%c0_3, %c0_4, %c0_5, %c0_6] : memref<1x8x18x4xbf16, #tpu.memory_space<vmem>>, vector<1x2x18x4xbf16>
    %3 = vector.shape_cast %2 : vector<1x2x18x4xbf16> to vector<2x18x4xbf16>
    %4 = tpu.concatenate %1, %3 in 0 : vector<16x18x4xbf16>, vector<2x18x4xbf16> -> vector<18x18x4xbf16>
    %5 = vector.extract_strided_slice %4 {offsets = [0, 0, 0], sizes = [16, 18, 4], strides = [1, 1, 1]} : vector<18x18x4xbf16> to vector<16x18x4xbf16>
    %6 = vector.extract_strided_slice %5 {offsets = [0, 0, 0], sizes = [16, 16, 4], strides = [1, 1, 1]} : vector<16x18x4xbf16> to vector<16x16x4xbf16>
    %7 = vector.extract_strided_slice %5 {offsets = [0, 1, 0], sizes = [16, 16, 4], strides = [1, 1, 1]} : vector<16x18x4xbf16> to vector<16x16x4xbf16>
    %8 = vector.extract_strided_slice %5 {offsets = [0, 2, 0], sizes = [16, 16, 4], strides = [1, 1, 1]} : vector<16x18x4xbf16> to vector<16x16x4xbf16>
    %9 = vector.extract_strided_slice %4 {offsets = [1, 0, 0], sizes = [16, 18, 4], strides = [1, 1, 1]} : vector<18x18x4xbf16> to vector<16x18x4xbf16>
    %10 = vector.extract_strided_slice %9 {offsets = [0, 0, 0], sizes = [16, 16, 4], strides = [1, 1, 1]} : vector<16x18x4xbf16> to vector<16x16x4xbf16>
    %11 = vector.extract_strided_slice %9 {offsets = [0, 1, 0], sizes = [16, 16, 4], strides = [1, 1, 1]} : vector<16x18x4xbf16> to vector<16x16x4xbf16>
    %12 = vector.extract_strided_slice %9 {offsets = [0, 2, 0], sizes = [16, 16, 4], strides = [1, 1, 1]} : vector<16x18x4xbf16> to vector<16x16x4xbf16>
    %13 = vector.extract_strided_slice %4 {offsets = [2, 0, 0], sizes = [16, 18, 4], strides = [1, 1, 1]} : vector<18x18x4xbf16> to vector<16x18x4xbf16>
    %14 = vector.extract_strided_slice %13 {offsets = [0, 0, 0], sizes = [16, 16, 4], strides = [1, 1, 1]} : vector<16x18x4xbf16> to vector<16x16x4xbf16>
    %15 = vector.extract_strided_slice %13 {offsets = [0, 1, 0], sizes = [16, 16, 4], strides = [1, 1, 1]} : vector<16x18x4xbf16> to vector<16x16x4xbf16>
    %16 = vector.extract_strided_slice %13 {offsets = [0, 2, 0], sizes = [16, 16, 4], strides = [1, 1, 1]} : vector<16x18x4xbf16> to vector<16x16x4xbf16>
    %17 = tpu.concatenate %6, %7, %8, %10, %11, %12, %14, %15, %16 in 2 : vector<16x16x4xbf16>, vector<16x16x4xbf16>, vector<16x16x4xbf16>, vector<16x16x4xbf16>, vector<16x16x4xbf16>, vector<16x16x4xbf16>, vector<16x16x4xbf16>, vector<16x16x4xbf16>, vector<16x16x4xbf16> -> vector<16x16x36xbf16>
    %18 = vector.shape_cast %17 : vector<16x16x36xbf16> to vector<256x36xbf16>
    %c0_7 = arith.constant 0 : index
    %c0_8 = arith.constant 0 : index
    %19 = vector.load %arg4[%c0_7, %c0_8] : memref<36x32xbf16, #tpu.memory_space<vmem>>, vector<36x32xbf16>
    %cst = arith.constant dense<0.000000e+00> : vector<256x32xf32>
    %20 = tpu.matmul %18, %19, %cst {dimension_numbers = #tpu.dot_dimension_numbers<[1], [0], [0], [1], [0, 0, 1, 1], [], []>} : vector<256x36xbf16>, vector<36x32xbf16>, vector<256x32xf32> -> vector<256x32xf32>
    %21 = vector.shape_cast %20 : vector<256x32xf32> to vector<16x16x32xf32>
    %c0_9 = arith.constant 0 : index
    %c0_10 = arith.constant 0 : index
    %22 = vector.load %arg5[%c0_9, %c0_10] : memref<1x32xf32, #tpu.memory_space<vmem>>, vector<1x32xf32>
    %23 = vector.shape_cast %22 : vector<1x32xf32> to vector<1x1x32xf32>
    %24 = vector.broadcast %23 : vector<1x1x32xf32> to vector<16x16x32xf32>
    %25 = arith.addf %21, %24 : vector<16x16x32xf32>
    %26 = arith.truncf %25 : vector<16x16x32xf32> to vector<16x16x32xbf16>
    %c0_11 = arith.constant 0 : index
    %c0_12 = arith.constant 0 : index
    %c0_13 = arith.constant 0 : index
    %c0_14 = arith.constant 0 : index
    %27 = vector.load %arg6[%c0_11, %c0_12, %c0_13, %c0_14] : memref<1x16x16x32xbf16, #tpu.memory_space<vmem>>, vector<1x16x16x32xbf16>
    %28 = vector.shape_cast %27 : vector<1x16x16x32xbf16> to vector<16x16x32xbf16>
    %29 = vector.shape_cast %26 : vector<16x16x32xbf16> to vector<1x16x16x32xbf16>
    tpu.vector_store %arg6[%c0_11, %c0_12, %c0_13, %c0_14], %29 {strides = array<i32>} : memref<1x16x16x32xbf16, #tpu.memory_space<vmem>>, vector<1x16x16x32xbf16>,
    return
  }
  func.func @transform_0(%arg0: i32, %arg1: i32) -> (i32, i32, i32, i32) {
    %c0_i32 = arith.constant 0 : i32
    %c0_i32_0 = arith.constant 0 : i32
    %c0_i32_1 = arith.constant 0 : i32
    return %arg0, %arg1, %c0_i32, %c0_i32_0 : i32, i32, i32, i32
  }
  func.func @transform_1(%arg0: i32, %arg1: i32) -> (i32, i32, i32, i32) {
    %c1_i32 = arith.constant 1 : i32
    %0 = arith.addi %arg1, %c1_i32 : i32
    %c2_i32 = arith.constant 2 : i32
    %1 = arith.muli %0, %c2_i32 : i32
    %c0_i32 = arith.constant 0 : i32
    %c0_i32_0 = arith.constant 0 : i32
    %c0_i32_1 = arith.constant 0 : i32
    return %arg0, %1, %c0_i32, %c0_i32_0 : i32, i32, i32, i32
  }
  func.func @transform_2(%arg0: i32, %arg1: i32) -> (i32, i32) {
    %c0_i32 = arith.constant 0 : i32
    %c0_i32_0 = arith.constant 0 : i32
    %c0_i32_1 = arith.constant 0 : i32
    return %c0_i32, %c0_i32_0 : i32, i32
  }
  func.func @transform_3(%arg0: i32, %arg1: i32) -> (i32, i32) {
    %c0_i32 = arith.constant 0 : i32
    %c0_i32_0 = arith.constant 0 : i32
    %c0_i32_1 = arith.constant 0 : i32
    return %c0_i32, %c0_i32_0 : i32, i32
  }
  func.func @transform_4(%arg0: i32, %arg1: i32) -> (i32, i32, i32, i32) {
    %c0_i32 = arith.constant 0 : i32
    %c0_i32_0 = arith.constant 0 : i32
    %c0_i32_1 = arith.constant 0 : i32
    return %arg0, %arg1, %c0_i32, %c0_i32_0 : i32, i32, i32, i32
  }
}

module attributes {stable_mosaic.version = 11 : i64} {
  func.func @_scale_shift_act_kernel(%arg0: i32, %arg1: i32, %arg2: memref<1x256x32xbf16, #tpu.memory_space<vmem>>, %arg3: memref<1x1x32xf32, #tpu.memory_space<vmem>>, %arg4: memref<1x1x32xf32, #tpu.memory_space<vmem>>, %arg5: memref<1x256x32xf32, #tpu.memory_space<vmem>>) attributes {dimension_semantics = [#tpu.dimension_semantics<parallel>, #tpu.dimension_semantics<parallel>], iteration_bounds = array<i64: 2, 1>, scalar_prefetch = 0 : i64, scratch_operands = 0 : i64, tpu.core_type = #tpu.core_type<tc>, window_params = [{transform_indices = @transform_0, window_bounds = array<i64: 1, 256, 32>}, {transform_indices = @transform_1, window_bounds = array<i64: 1, 1, 32>}, {transform_indices = @transform_2, window_bounds = array<i64: 1, 1, 32>}, {transform_indices = @transform_3, window_bounds = array<i64: 1, 256, 32>}]} {
    %c0 = arith.constant 0 : index
    %c0_0 = arith.constant 0 : index
    %c0_1 = arith.constant 0 : index
    %0 = vector.load %arg2[%c0, %c0_0, %c0_1] : memref<1x256x32xbf16, #tpu.memory_space<vmem>>, vector<1x256x32xbf16>
    %1 = vector.shape_cast %0 : vector<1x256x32xbf16> to vector<256x32xbf16>
    %2 = arith.extf %1 : vector<256x32xbf16> to vector<256x32xf32>
    %c0_2 = arith.constant 0 : index
    %c0_3 = arith.constant 0 : index
    %c0_4 = arith.constant 0 : index
    %3 = vector.load %arg3[%c0_2, %c0_3, %c0_4] : memref<1x1x32xf32, #tpu.memory_space<vmem>>, vector<1x1x32xf32>
    %4 = vector.shape_cast %3 : vector<1x1x32xf32> to vector<1x32xf32>
    %5 = vector.broadcast %4 : vector<1x32xf32> to vector<256x32xf32>
    %6 = arith.mulf %2, %5 : vector<256x32xf32>
    %c0_5 = arith.constant 0 : index
    %c0_6 = arith.constant 0 : index
    %c0_7 = arith.constant 0 : index
    %7 = vector.load %arg4[%c0_5, %c0_6, %c0_7] : memref<1x1x32xf32, #tpu.memory_space<vmem>>, vector<1x1x32xf32>
    %8 = vector.shape_cast %7 : vector<1x1x32xf32> to vector<1x32xf32>
    %9 = vector.broadcast %8 : vector<1x32xf32> to vector<256x32xf32>
    %10 = arith.addf %6, %9 : vector<256x32xf32>
    %cst = arith.constant 0.000000e+00 : f32
    %11 = vector.broadcast %cst : f32 to vector<256x32xf32>
    %12 = arith.maximumf %10, %11 : vector<256x32xf32>
    %c0_8 = arith.constant 0 : index
    %c0_9 = arith.constant 0 : index
    %c0_10 = arith.constant 0 : index
    %13 = vector.load %arg5[%c0_8, %c0_9, %c0_10] : memref<1x256x32xf32, #tpu.memory_space<vmem>>, vector<1x256x32xf32>
    %14 = vector.shape_cast %13 : vector<1x256x32xf32> to vector<256x32xf32>
    %15 = vector.shape_cast %12 : vector<256x32xf32> to vector<1x256x32xf32>
    tpu.vector_store %arg5[%c0_8, %c0_9, %c0_10], %15 {strides = array<i32>} : memref<1x256x32xf32, #tpu.memory_space<vmem>>, vector<1x256x32xf32>,
    return
  }
  func.func @transform_0(%arg0: i32, %arg1: i32) -> (i32, i32, i32) {
    %c0_i32 = arith.constant 0 : i32
    %c0_i32_0 = arith.constant 0 : i32
    return %arg0, %arg1, %c0_i32 : i32, i32, i32
  }
  func.func @transform_1(%arg0: i32, %arg1: i32) -> (i32, i32, i32) {
    %c0_i32 = arith.constant 0 : i32
    %c0_i32_0 = arith.constant 0 : i32
    %c0_i32_1 = arith.constant 0 : i32
    return %arg0, %c0_i32, %c0_i32_0 : i32, i32, i32
  }
  func.func @transform_2(%arg0: i32, %arg1: i32) -> (i32, i32, i32) {
    %c0_i32 = arith.constant 0 : i32
    %c0_i32_0 = arith.constant 0 : i32
    %c0_i32_1 = arith.constant 0 : i32
    return %arg0, %c0_i32, %c0_i32_0 : i32, i32, i32
  }
  func.func @transform_3(%arg0: i32, %arg1: i32) -> (i32, i32, i32) {
    %c0_i32 = arith.constant 0 : i32
    %c0_i32_0 = arith.constant 0 : i32
    return %arg0, %arg1, %c0_i32 : i32, i32, i32
  }
}

</mosaic_0001>

<bundles_post_ra>
// kernel: squeeze.2
= control target key start
LH: loop header
LB: loop body
LE: loop exit
PB: predicated region body
PF: predicated region fallthrough
CT: control target
= control target key end

     0   :  { %s47_s8 = smov 104   ;;  %vm8_vm0 = vcmask 64512   ;;  %s48_s9 = smov 112   ;;  %s68_s0 = inlined_call_operand.vmem [shape: f32[2,32], index: 0, kind: input, shape index: {}]   ;;  %s69_s1 = inlined_call_operand.vmem [shape: f32[2,4,8], index: 1, kind: output, shape index: {}]  }
   0x1   :  { %v5_v0 = vld [vmem:[%s68_s0] sm:$0x3]  ;;  %s46_s0 = smov 120  }
   0x2   :  { %6 = vst [vmem:[#allocation1] sm:$0x3] %v5_v0 }
   0x9   :  { %v10_v1 = vld [vmem:[#allocation1] sm:$0x3]  }
   0xa   :  { %v22_v2 = vld [vmem:[#allocation1] sm:$0x3]   ;;  %11 = vrot.lane.b32.xlu0 %v10_v1, %s46_s0 }
   0xb   :  { %23 = vrot.lane.b32.xlu1 %v22_v2, %s47_s8  ;;  %v7_v3 = vld [vmem:[#allocation1] sm:$0x3]  }
   0xc   :  { %v16_v4 = vld [vmem:[#allocation1] sm:$0x3]   ;;  %9 = vst.msk [vmem:[#allocation0] ss:$8 sm:$0x3] %vm8_vm0, %v7_v3  }
   0xe   :  { %17 = vrot.lane.b32.xlu0 %v16_v4, %s48_s9 }
  0x7c   :  { %v12_v5 = vpop.permute.xlu0 %11  }
  0x7d   :  { %v24_v6 = vpop.permute.xlu1 %23   ;;  %15 = vst.msk [vmem:[#allocation0 + $0x1] ss:$8 sm:$0x3] %vm8_vm0, %v12_v5  }
  0x7e   :  { %27 = vst.msk [vmem:[#allocation0 + $0x3] ss:$8 sm:$0x3] %vm8_vm0, %v24_v6  }
  0x80   :  { %v18_v7 = vpop.permute.xlu0 %17  }
  0x81   :  { %21 = vst.msk [vmem:[#allocation0 + $0x2] ss:$8 sm:$0x3] %vm8_vm0, %v18_v7  }
  0x88   :  { %v32_v8 = vld [vmem:[#allocation0] sm:$0xf]  ;;  %v37_v9 = vld [vmem:[#allocation0 + $0x8] sm:$0xf] }
  0x89   :  { %35 = vst [vmem:[%s69_s1] sm:$0xf] %v32_v8  ;;  %42 = vst [vmem:[%s69_s1 + $0x4] sm:$0xf] %v37_v9 }

// kernel: conv_module_forward.4
= control target key start
LH: loop header
LB: loop body
LE: loop exit
PB: predicated region body
PF: predicated region fallthrough
CT: control target
= control target key end

     0   :  { %s607_s6 = smov 0   ;;  %s609_s7 = smov 0   ;;  %s729_s0 = inlined_call_operand.vmem [shape: bf16[2,256,32], index: 0, kind: input, shape index: {}]   ;;  %s730_s1 = inlined_call_operand.vmem [shape: f32[2,2,32], index: 1, kind: output, shape index: {}]  }
   0x1   :  { %s611_s8 = smov 0  }
   0x2 LB: > { %s23_s9 = sadd.s32 1, %s590_s7  ;;  %p461_p0 = scmp.ge.s32.totalorder %s594_s8, 1  ;;  %s594_s8 = sphi %s611_s8, %s11_s8   ;;  %s590_s7 = sphi %s609_s7, %s732_s7   ;;  %s586_s6 = sphi %s607_s6, %s731_s6  }
   0x3   : > { %p25_p1 = scmp.ge.s32.totalorder %s23_s9, 2  ;;  %p106_p2 = scmp.lt.s32.totalorder %s594_s8, 3 }
   0x5   : > { %s734_s9 = smov (%p25_p1, %s23_s9), 0  ;;  %p107_p3 = pnand %p461_p0, %p106_p2 }
   0x6   : > { %p130_p4 = scmp.lt.s32.totalorder (!%p107_p3), %s586_s6, 1 }
   0x7   : > { %110 = sbr.rel (%p107_p3) target bundleno = 103 (0x67), region = 24 }
   0xc   : > { %s736_s6 = smov (!%p130_p4, %s586_s6), 1  ;;  %vm147_vm0 = vcmask 254976   ;;  %v596_v0 = vmov 0.0   ;;  %vm213_vm1 = vcmask 261120   ;;  %vm385_vm2 = vcmask 1040384  }
   0xd   : > { %s467_s10 = sshll.u32 %s736_s6, 7  ;;  %s464_s11 = sshll.u32 %s736_s6, 1 }
   0xe   : > { %s628_s14 = scalar_lea.vmem %s730_s1, %s464_s11  ;;  %s635_s17 = scalar_lea.vmem %s729_s0, %s467_s10 }
   0xf   : > { %148 = vst.msk [vmem:[%s628_s14] sm:$0x3] %vm147_vm0, %v596_v0  ;;  %v469_v1 = vld [vmem:[%s635_s17] sm:$0xff]   ;;  %v532_v2 = vld [vmem:[%s635_s17 + $0x8] sm:$0xff]   ;;  %v533_v6 = vld [vmem:[%s635_s17 + $0x10] sm:$0xff]  }
  0x10   : > { %v470_v3 = vunpack.c.l.bf16 %v469_v1  ;;  %v471_v4 = vunpack.c.h.bf16 %v469_v1  ;;  %v474_v5 = vunpack.c.l.bf16 %v532_v2  ;;  %v475_v7 = vunpack.c.h.bf16 %v532_v2  ;;  %v534_v14 = vld [vmem:[%s635_s17 + $0x18] sm:$0xff]   ;;  %v535_v21 = vld [vmem:[%s635_s17 + $0x20] sm:$0xff]   ;;  %v536_v27 = vld [vmem:[%s635_s17 + $0x28] sm:$0xff]  }
  0x11   : > { %v478_v12 = vunpack.c.l.bf16 %v533_v6  ;;  %v479_v16 = vunpack.c.h.bf16 %v533_v6  ;;  %v482_v19 = vunpack.c.l.bf16 %v534_v14  ;;  %v483_v23 = vunpack.c.h.bf16 %v534_v14  ;;  %v537_v34 = vld [vmem:[%s635_s17 + $0x30] sm:$0xff]   ;;  %v538_v50 = vld [vmem:[%s635_s17 + $0x38] sm:$0xff]   ;;  %v539_v63 = vld [vmem:[%s635_s17 + $0x40] sm:$0xff]  }
  0x12   : > { %v214_v8 = vsel %vm213_vm1, %v470_v3, 0.0  ;;  %v215_v9 = vsel %vm213_vm1, %v471_v4, 0.0  ;;  %v217_v10 = vsel %vm213_vm1, %v474_v5, 0.0  ;;  %v219_v13 = vsel %vm213_vm1, %v475_v7, 0.0 }
  0x13   : > { %v216_v11 = vadd.f32 %v215_v9, %v214_v8  ;;  %v221_v17 = vsel %vm213_vm1, %v478_v12, 0.0  ;;  %v223_v20 = vsel %vm213_vm1, %v479_v16, 0.0  ;;  %v225_v24 = vsel %vm213_vm1, %v482_v19, 0.0 }
  0x14   : > { %v486_v26 = vunpack.c.l.bf16 %v535_v21  ;;  %v227_v28 = vsel %vm213_vm1, %v483_v23, 0.0  ;;  %v487_v30 = vunpack.c.h.bf16 %v535_v21  ;;  %v490_v32 = vunpack.c.l.bf16 %v536_v27 }
  0x15   : > { %v218_v15 = vadd.f32 %v217_v10, %v216_v11  ;;  %v283_v36 = vmul.f32 %v470_v3, %v470_v3  ;;  %v284_v37 = vmul.f32 %v471_v4, %v471_v4  ;;  %v285_v38 = vmul.f32 %v474_v5, %v474_v5 }
  0x16   : > { %v229_v31 = vsel %vm213_vm1, %v486_v26, 0.0  ;;  %v231_v35 = vsel %vm213_vm1, %v487_v30, 0.0  ;;  %v491_v39 = vunpack.c.h.bf16 %v536_v27  ;;  %v233_v41 = vsel %vm213_vm1, %v490_v32, 0.0 }
  0x17   : > { %v220_v18 = vadd.f32 %v219_v13, %v218_v15  ;;  %v286_v42 = vmul.f32 %v475_v7, %v475_v7  ;;  %v494_v43 = vunpack.c.l.bf16 %v537_v34  ;;  %v287_v46 = vmul.f32 %v478_v12, %v478_v12  ;;  %v540_v12 = vld [vmem:[%s635_s17 + $0x48] sm:$0xff]  }
  0x18   : > { %v235_v45 = vsel %vm213_vm1, %v491_v39, 0.0  ;;  %v315_v47 = vsel %vm213_vm1, %v283_v36, 0.0  ;;  %v316_v48 = vsel %vm213_vm1, %v284_v37, 0.0  ;;  %v318_v49 = vsel %vm213_vm1, %v285_v38, 0.0  ;;  %v542_v38 = vld [vmem:[%s635_s17 + $0x58] sm:$0xff]  }
  0x19   : > { %v222_v22 = vadd.f32 %v221_v17, %v220_v18  ;;  %v317_v52 = vadd.f32 %v316_v48, %v315_v47  ;;  %v495_v53 = vunpack.c.h.bf16 %v537_v34  ;;  %v237_v54 = vsel %vm213_vm1, %v494_v43, 0.0 }
  0x1a   : > { %v288_v55 = vmul.f32 %v479_v16, %v479_v16  ;;  %v320_v56 = vsel %vm213_vm1, %v286_v42, 0.0  ;;  %v498_v59 = vunpack.c.l.bf16 %v538_v50  ;;  %v289_v61 = vmul.f32 %v482_v19, %v482_v19 }
  0x1b   : > { %v224_v25 = vadd.f32 %v223_v20, %v222_v22  ;;  %v319_v58 = vadd.f32 %v318_v49, %v317_v52  ;;  %v239_v60 = vsel %vm213_vm1, %v495_v53, 0.0  ;;  %v322_v62 = vsel %vm213_vm1, %v287_v46, 0.0 }
  0x1c   : > { %v499_v2 = vunpack.c.h.bf16 %v538_v50  ;;  %v241_v3 = vsel %vm213_vm1, %v498_v59, 0.0  ;;  %v290_v4 = vmul.f32 %v483_v23, %v483_v23  ;;  %v324_v5 = vsel %vm213_vm1, %v288_v55, 0.0 }
  0x1d   : > { %v226_v29 = vadd.f32 %v225_v24, %v224_v25  ;;  %v321_v1 = vadd.f32 %v320_v56, %v319_v58  ;;  %v502_v8 = vunpack.c.l.bf16 %v539_v63  ;;  %v291_v10 = vmul.f32 %v486_v26, %v486_v26  ;;  %v541_v25 = vld [vmem:[%s635_s17 + $0x50] sm:$0xff]  }
  0x1e   : > { %v243_v9 = vsel %vm213_vm1, %v499_v2, 0.0  ;;  %v326_v11 = vsel %vm213_vm1, %v289_v61, 0.0  ;;  %v503_v15 = vunpack.c.h.bf16 %v539_v63  ;;  %v292_v17 = vmul.f32 %v487_v30, %v487_v30 }
  0x1f   : > { %v228_v33 = vadd.f32 %v227_v28, %v226_v29  ;;  %v323_v7 = vadd.f32 %v322_v62, %v321_v1  ;;  %v245_v16 = vsel %vm213_vm1, %v502_v8, 0.0  ;;  %v328_v18 = vsel %vm213_vm1, %v290_v4, 0.0 }
  0x20   : > { %v506_v21 = vunpack.c.l.bf16 %v540_v12  ;;  %v247_v22 = vsel %vm213_vm1, %v503_v15, 0.0  ;;  %v293_v23 = vmul.f32 %v490_v32, %v490_v32  ;;  %v330_v24 = vsel %vm213_vm1, %v291_v10, 0.0 }
  0x21   : > { %v230_v40 = vadd.f32 %v229_v31, %v228_v33  ;;  %v325_v14 = vadd.f32 %v324_v5, %v323_v7  ;;  %v507_v28 = vunpack.c.h.bf16 %v540_v12  ;;  %v294_v31 = vmul.f32 %v491_v39, %v491_v39 }
  0x22   : > { %v249_v29 = vsel %vm213_vm1, %v506_v21, 0.0  ;;  %v332_v30 = vsel %vm213_vm1, %v292_v17, 0.0  ;;  %v295_v37 = vmul.f32 %v494_v43, %v494_v43  ;;  %v334_v32 = vsel %vm213_vm1, %v293_v23, 0.0 }
  0x23   : > { %v232_v44 = vadd.f32 %v231_v35, %v230_v40  ;;  %v327_v20 = vadd.f32 %v326_v11, %v325_v14  ;;  %v510_v35 = vunpack.c.l.bf16 %v541_v25  ;;  %v251_v36 = vsel %vm213_vm1, %v507_v28, 0.0 }
  0x24   : > { %v511_v42 = vunpack.c.h.bf16 %v541_v25  ;;  %v336_v39 = vsel %vm213_vm1, %v294_v31, 0.0  ;;  %v514_v48 = vunpack.c.l.bf16 %v542_v38  ;;  %v297_v50 = vmul.f32 %v498_v59, %v498_v59 }
  0x25   : > { %v234_v51 = vadd.f32 %v233_v41, %v232_v44  ;;  %v329_v27 = vadd.f32 %v328_v18, %v327_v20  ;;  %v253_v44 = vsel %vm213_vm1, %v510_v35, 0.0  ;;  %v338_v43 = vsel %vm213_vm1, %v295_v37, 0.0 }
  0x26   : > { %v255_v49 = vsel %vm213_vm1, %v511_v42, 0.0  ;;  %v515_v55 = vunpack.c.h.bf16 %v542_v38  ;;  %v257_v56 = vsel %vm213_vm1, %v514_v48, 0.0  ;;  %v299_v63 = vmul.f32 %v502_v8, %v502_v8  ;;  %v545_v8 = vld [vmem:[%s635_s17 + $0x70] sm:$0xff]  }
  0x27   : > { %v236_v57 = vadd.f32 %v235_v45, %v234_v51  ;;  %v331_v34 = vadd.f32 %v330_v24, %v329_v27  ;;  %v296_v45 = vmul.f32 %v495_v53, %v495_v53  ;;  %v543_v51 = vld [vmem:[%s635_s17 + $0x60] sm:$0xff]   ;;  %v342_v59 = vsel %vm213_vm1, %v297_v50, 0.0 }
  0x28   : > { %v518_v61 = vunpack.c.l.bf16 %v543_v51  ;;  %v259_v62 = vsel %vm213_vm1, %v515_v55, 0.0  ;;  %v519_v4 = vunpack.c.h.bf16 %v543_v51  ;;  %v301_v12 = vmul.f32 %v506_v21, %v506_v21 }
  0x29   : > { %v238_v0 = vadd.f32 %v237_v54, %v236_v57  ;;  %v333_v41 = vadd.f32 %v332_v30, %v331_v34  ;;  %v298_v57 = vmul.f32 %v499_v2, %v499_v2  ;;  %v340_v53 = vsel %vm213_vm1, %v296_v45, 0.0  ;;  %v546_v34 = vld [vmem:[%s635_s17 + $0x78] sm:$0xff]  }
  0x2a   : > { %v261_v5 = vsel %vm213_vm1, %v518_v61, 0.0  ;;  %v263_v11 = vsel %vm213_vm1, %v519_v4, 0.0  ;;  %v526_v23 = vunpack.c.l.bf16 %v545_v8  ;;  %v303_v25 = vmul.f32 %v510_v35, %v510_v35 }
  0x2b   : > { %v240_v6 = vadd.f32 %v239_v60, %v238_v0  ;;  %v335_v47 = vadd.f32 %v334_v32, %v333_v41  ;;  %v544_v0 = vld [vmem:[%s635_s17 + $0x68] sm:$0xff]   ;;  %v344_v2 = vsel %vm213_vm1, %v298_v57, 0.0  ;;  %v350_v21 = vsel %vm213_vm1, %v301_v12, 0.0 }
  0x2c   : > { %v522_v10 = vunpack.c.l.bf16 %v544_v0  ;;  %v523_v17 = vunpack.c.h.bf16 %v544_v0  ;;  %v269_v31 = vsel %vm213_vm1, %v526_v23, 0.0  ;;  %v304_v30 = vmul.f32 %v511_v42, %v511_v42 }
  0x2d   : > { %v242_v13 = vadd.f32 %v241_v3, %v240_v6  ;;  %v337_v54 = vadd.f32 %v336_v39, %v335_v47  ;;  %v300_v6 = vmul.f32 %v503_v15, %v503_v15  ;;  %v305_v32 = vmul.f32 %v514_v48, %v514_v48 }
  0x2e   : > { %v265_v18 = vsel %vm213_vm1, %v522_v10, 0.0  ;;  %v267_v24 = vsel %vm213_vm1, %v523_v17, 0.0  ;;  %v354_v38 = vsel %vm213_vm1, %v303_v25, 0.0  ;;  %v530_v41 = vunpack.c.l.bf16 %v546_v34 }
  0x2f   : > { %v244_v19 = vadd.f32 %v243_v9, %v242_v13  ;;  %v339_v60 = vadd.f32 %v338_v43, %v337_v54  ;;  %v346_v13 = vsel %vm213_vm1, %v299_v63, 0.0  ;;  %v348_v15 = vsel %vm213_vm1, %v300_v6, 0.0 }
  0x30   : > { %v356_v45 = vsel %vm213_vm1, %v304_v30, 0.0  ;;  %v273_v42 = vsel %vm213_vm1, %v530_v41, 0.0  ;;  %v307_v47 = vmul.f32 %v518_v61, %v518_v61  ;;  %v531_v43 = vunpack.c.h.bf16 %v546_v34 }
  0x31   : > { %v246_v26 = vadd.f32 %v245_v16, %v244_v19  ;;  %v341_v3 = vadd.f32 %v340_v53, %v339_v60  ;;  %v302_v19 = vmul.f32 %v507_v28, %v507_v28  ;;  %v308_v51 = vmul.f32 %v519_v4, %v519_v4 }
  0x32   : > { %v309_v57 = vmul.f32 %v522_v10, %v522_v10  ;;  %v311_v63 = vmul.f32 %v526_v23, %v526_v23  ;;  %v313_v6 = vmul.f32 %v530_v41, %v530_v41 }
  0x33   : > { %v248_v33 = vadd.f32 %v247_v22, %v246_v26  ;;  %v343_v9 = vadd.f32 %v342_v59, %v341_v3  ;;  %v364_v60 = vsel %vm213_vm1, %v308_v51, 0.0 }
  0x34   : > { %v366_v59 = vsel %vm213_vm1, %v309_v57, 0.0 }
  0x35   : > { %v250_v40 = vadd.f32 %v249_v29, %v248_v33  ;;  %v345_v16 = vadd.f32 %v344_v2, %v343_v9  ;;  %v527_v29 = vunpack.c.h.bf16 %v545_v8  ;;  %v352_v33 = vsel %vm213_vm1, %v302_v19, 0.0 }
  0x36   : > { %v370_v2 = vsel %vm213_vm1, %v311_v63, 0.0  ;;  %v314_v9 = vmul.f32 %v531_v43, %v531_v43 }
  0x37   : > { %v252_v46 = vadd.f32 %v251_v36, %v250_v40  ;;  %v347_v22 = vadd.f32 %v346_v13, %v345_v16  ;;  %v271_v37 = vsel %vm213_vm1, %v527_v29, 0.0  ;;  %v374_v13 = vsel %vm213_vm1, %v313_v6, 0.0 }
  0x39   : > { %v254_v52 = vadd.f32 %v253_v44, %v252_v46  ;;  %v349_v27 = vadd.f32 %v348_v15, %v347_v22  ;;  %v306_v44 = vmul.f32 %v515_v55, %v515_v55  ;;  %v362_v55 = vsel %vm213_vm1, %v307_v47, 0.0 }
  0x3b   : > { %v256_v58 = vadd.f32 %v255_v49, %v254_v52  ;;  %v351_v36 = vadd.f32 %v350_v21, %v349_v27  ;;  %v358_v49 = vsel %vm213_vm1, %v305_v32, 0.0  ;;  %v360_v48 = vsel %vm213_vm1, %v306_v44, 0.0  ;;  %v384_v27 = vld [vmem:[%s628_s14] sm:$0x3] }
  0x3d   : > { %v258_v1 = vadd.f32 %v257_v56, %v256_v58  ;;  %v353_v35 = vadd.f32 %v352_v33, %v351_v36  ;;  %v275_v56 = vsel %vm213_vm1, %v531_v43, 0.0  ;;  %v310_v58 = vmul.f32 %v523_v17, %v523_v17 }
  0x3f   : > { %v260_v7 = vadd.f32 %v259_v62, %v258_v1  ;;  %v355_v46 = vadd.f32 %v354_v38, %v353_v35  ;;  %v312_v1 = vmul.f32 %v527_v29, %v527_v29  ;;  %v368_v3 = vsel %vm213_vm1, %v310_v58, 0.0 }
  0x41   : > { %v262_v14 = vadd.f32 %v261_v5, %v260_v7  ;;  %v357_v50 = vadd.f32 %v356_v45, %v355_v46  ;;  %v372_v10 = vsel %vm213_vm1, %v312_v1, 0.0 }
  0x43   : > { %v264_v20 = vadd.f32 %v263_v11, %v262_v14  ;;  %v359_v54 = vadd.f32 %v358_v49, %v357_v50  ;;  %v376_v14 = vsel %vm213_vm1, %v314_v9, 0.0 }
  0x45   : > { %v266_v26 = vadd.f32 %v265_v18, %v264_v20  ;;  %v361_v53 = vadd.f32 %v360_v48, %v359_v54 }
  0x47   : > { %v268_v28 = vadd.f32 %v267_v24, %v266_v26  ;;  %v363_v61 = vadd.f32 %v362_v55, %v361_v53 }
  0x49   : > { %v270_v40 = vadd.f32 %v269_v31, %v268_v28  ;;  %v365_v0 = vadd.f32 %v364_v60, %v363_v61 }
  0x4b   : > { %v272_v39 = vadd.f32 %v271_v37, %v270_v40  ;;  %v367_v5 = vadd.f32 %v366_v59, %v365_v0 }
  0x4d   : > { %v274_v52 = vadd.f32 %v273_v42, %v272_v39  ;;  %v369_v7 = vadd.f32 %v368_v3, %v367_v5 }
  0x4f   : > { %v276_v62 = vadd.f32 %v275_v56, %v274_v52  ;;  %v371_v12 = vadd.f32 %v370_v2, %v369_v7 }
  0x51   : > { %v277_v4 = vrot.slane %v276_v62, 4  ;;  %v373_v8 = vadd.f32 %v372_v10, %v371_v12 }
  0x53   : > { %v278_v11 = vadd.f32 %v277_v4, %v276_v62  ;;  %v375_v17 = vadd.f32 %v374_v13, %v373_v8 }
  0x55   : > { %v279_v16 = vrot.slane %v278_v11, 2  ;;  %v377_v18 = vadd.f32 %v376_v14, %v375_v17 }
  0x57   : > { %v280_v19 = vadd.f32 %v279_v16, %v278_v11  ;;  %v378_v15 = vrot.slane %v377_v18, 4 }
  0x59   : > { %v379_v20 = vadd.f32 %v378_v15, %v377_v18  ;;  %v281_v22 = vrot.slane %v280_v19, 1 }
  0x5b   : > { %v380_v23 = vrot.slane %v379_v20, 2  ;;  %v282_v25 = vadd.f32 %v281_v22, %v280_v19 }
  0x5d   : > { %v381_v24 = vadd.f32 %v380_v23, %v379_v20 }
  0x5f   : > { %v382_v21 = vrot.slane %v381_v24, 1 }
  0x61   : > { %v383_v26 = vadd.f32 %v382_v21, %v381_v24 }
  0x63   : > { %v386_v29 = vsel %vm385_vm2, %v282_v25, %v383_v26 }
  0x64   : > { %v387_v31 = vadd.f32 %v386_v29, %v384_v27 }
  0x66   : > { %389 = vst.msk [vmem:[%s628_s14] sm:$0x3] %vm147_vm0, %v387_v31 }
  0x67 PF: > { %s11_s8 = sadd.s32 1, %s594_s8   ;;  %s731_s6 = smov %s590_s7 }
  0x68   : > { %p8_p5 = scmp.ge.s32.totalorder %s11_s8, 4   ;;  %s732_s7 = smov %s734_s9 }
  0x6a   :  { %10 = sbr.rel (!%p8_p5) target bundleno = 2 (0x2), region = 58 }

// kernel: conv_module_forward.5
= control target key start
LH: loop header
LB: loop body
LE: loop exit
PB: predicated region body
PF: predicated region fallthrough
CT: control target
= control target key end

     0   :  { %8 = vsyncpa [#allocation3], 0  ;;  %s1079_s0 = inlined_call_operand.vmem [shape: bf16[2,256,32], index: 0, kind: input, shape index: {}]   ;;  %s1080_s1 = inlined_call_operand.vmem [shape: f32[2,1,32], index: 1, kind: input, shape index: {}]   ;;  %s1081_s2 = inlined_call_operand.vmem [shape: f32[2,1,32], index: 2, kind: input, shape index: {}]   ;;  %s1082_s3 = inlined_call_operand.hbm [shape: f32[2,256,32], index: 3, kind: output, shape index: {}]  }
   0x1   :  { %10 = vsyncpa [#allocation3 + $0x1], 0  ;;  %s802_s12 = smov 0   ;;  %s804_s13 = smov 0  }
   0x2   :  { %s806_s14 = smov 0   ;;  %s808_s15 = smov 0  }
   0x3   :  { %s810_s16 = smov 0   ;;  %s812_s17 = smov 0  }
   0x4 LB: > { %s548_s18 = sadd.s32 4294967295, %s777_s17   ;;  %s549_s19 = sadd.s32 4294967294, %s777_s17   ;;  %s777_s17 = sphi %s812_s17, %s16_s17   ;;  %s773_s16 = sphi %s810_s16, %s1089_s16   ;;  %s769_s15 = sphi %s808_s15, %s1088_s15   ;;  %s765_s14 = sphi %s806_s14, %s1087_s14   ;;  %s761_s13 = sphi %s804_s13, %s1086_s13   ;;  %s757_s12 = sphi %s802_s12, %s1085_s12  }
   0x5   : > { %s28_s20 = sadd.s32 1, %s773_s16  ;;  %s117_s21 = sadd.s32 1, %s765_s14 }
   0x6   : > { %p30_p0 = scmp.ge.s32.totalorder %s28_s20, 2  ;;  %p127_p1 = scmp.ne.s32.totalorder %s765_s14, %s761_s13 }
   0x7   : > { %p128_p2 = scmp.eq.s32.totalorder %s548_s18, 1  ;;  %p133_p3 = scmp.ne.s32.totalorder %s761_s13, %s757_s12 }
   0x8   : > { %s1091_s20 = smov (%p30_p0, %s28_s20), 0  ;;  %p134_p5 = scmp.eq.s32.totalorder %s549_s19, 1 }
   0x9   : > { %p842_p4 = por %p128_p2, %p127_p1  ;;  %s112_s23 = ssub.s32 %s773_s16, %s1091_s20 }
   0xa   : > { %p552_p6 = scmp.ge.s32.totalorder %s777_s17, 1  ;;  %p115_p7 = scmp.eq.s32.totalorder %s112_s23, 0 }
   0xb   : > { %p849_p8 = por %p134_p5, %p133_p3  ;;  %p177_p9 = scmp.lt.s32.totalorder %s777_s17, 3 }
   0xc   : > { %s855_s25 = scalar_select %p115_p7, %s765_s14, %s117_s21  }
   0xd   : > { %p178_p10 = pnand %p552_p6, %p177_p9 }
   0xe   : > { %p212_p11 = scmp.lt.s32.totalorder (!%p178_p10), %s769_s15, 1  ;;  %s208_s10 = sand.u32 (!%p178_p10), 1, %s761_s13  }
   0xf   : > { %181 = sbr.rel (%p178_p10) target bundleno = 74 (0x4a), region = 32  ;;  %s553_s11 = sshll.u32 (!%p178_p10), %s208_s10, 8 }
  0x10   : > { %s901_s18 = scalar_lea.vmem (!%p178_p10), [#allocation2], %s553_s11  ;;  %s564_s19 = sshll.u32 (!%p178_p10), %s769_s15, 12 }
  0x11   : > { %s451_s21 = sshll.u32 (!%p178_p10), %s901_s18, 4  ;;  %s779_s29 = smov (!%p178_p10), [#allocation2]   ;;  %s1014_s21 = int_to_ptr.vmem [resolvable:$true] %s451_s21 }
  0x12   : > { %s701_s28 = scalar_lea.vmem (!%p178_p10), %s1014_s21, 4096 }
  0x13   : > { %p702_p12 = scmp.ne.s32.totalorder (!%p178_p10), %s1014_s21, %s701_s28 }
  0x14   : > { %s213_s26 = scalar_select %p212_p11, %s769_s15, 1  ;;  %vm402_vm0 = vcmask 261120  }
  0x15   : > { %p703_p13 = pnand %p702_p12, %p842_p4 }
  0x16   : > { %s563_s27 = sshll.u32 %s213_s26, 7  ;;  %s223_s30 = scalar_lea.vmem %s1080_s1, %s213_s26 }
  0x17   : > { %s865_s6 = scalar_lea.vmem %s1079_s0, %s563_s27  ;;  %s226_s9 = scalar_lea.vmem %s1081_s2, %s213_s26  ;;  %v872_v1 = vld [vmem:[%s223_s30] ss:$0 sm:$0xff] }
  0x18   : > { %v566_v0 = vld [vmem:[%s865_s6] sm:$0xff]   ;;  %v629_v2 = vld [vmem:[%s865_s6 + $0x8] sm:$0xff]   ;;  %v630_v7 = vld [vmem:[%s865_s6 + $0x10] sm:$0xff]   ;;  %s1012_s26 = scalar_lea.hbm %s1082_s3, %s564_s19  ;;  %s1034_s27 = scalar_lea.sflag [#allocation3], %s208_s10 }
  0x19   : > { %v567_v3 = vunpack.c.l.bf16 %v566_v0  ;;  %v568_v4 = vunpack.c.h.bf16 %v566_v0  ;;  %v571_v5 = vunpack.c.l.bf16 %v629_v2  ;;  %v572_v6 = vunpack.c.h.bf16 %v629_v2  ;;  %v631_v8 = vld [vmem:[%s865_s6 + $0x18] sm:$0xff]   ;;  %v877_v9 = vld [vmem:[%s226_s9] ss:$0 sm:$0xff]  ;;  %v633_v31 = vld [vmem:[%s865_s6 + $0x28] sm:$0xff]   ;;  %p704_p0 = pneg %p703_p13  ;;  %s705_s30 = sshll.u32 %s779_s29, 4  ;;  %s706_s30 = int_to_ptr.vmem [resolvable:$false] %s705_s30 }
  0x1a   : > { %v575_v10 = vunpack.c.l.bf16 %v630_v7  ;;  %v576_v11 = vunpack.c.h.bf16 %v630_v7  ;;  %v579_v12 = vunpack.c.l.bf16 %v631_v8  ;;  %v580_v13 = vunpack.c.h.bf16 %v631_v8  ;;  %v632_v30 = vld [vmem:[%s865_s6 + $0x20] sm:$0xff]   ;;  %v634_v36 = vld [vmem:[%s865_s6 + $0x30] sm:$0xff]   ;;  %v635_v37 = vld [vmem:[%s865_s6 + $0x38] sm:$0xff]   ;;  %s707_s4 = scalar_lea.vmem %s706_s30, 8192  ;;  %p708_p1 = scmp.lt.s32.totalorder %s1014_s21, %s706_s30 }
  0x1b   : > { %v299_v14 = vmul.f32 %v567_v3, %v872_v1  ;;  %v300_v15 = vmul.f32 %v568_v4, %v872_v1  ;;  %v301_v16 = vmul.f32 %v571_v5, %v872_v1  ;;  %v302_v17 = vmul.f32 %v572_v6, %v872_v1  ;;  %v636_v3 = vld [vmem:[%s865_s6 + $0x40] sm:$0xff]   ;;  %v637_v4 = vld [vmem:[%s865_s6 + $0x48] sm:$0xff]   ;;  %p709_p2 = scmp.lt.s32.totalorder %s707_s4, %s701_s28 }
  0x1c   : > { %v303_v18 = vmul.f32 %v575_v10, %v872_v1  ;;  %v304_v19 = vmul.f32 %v576_v11, %v872_v1  ;;  %v305_v20 = vmul.f32 %v579_v12, %v872_v1  ;;  %v306_v21 = vmul.f32 %v580_v13, %v872_v1  ;;  %v638_v10 = vld [vmem:[%s865_s6 + $0x50] sm:$0xff]   ;;  %v639_v11 = vld [vmem:[%s865_s6 + $0x58] sm:$0xff]  }
  0x1d   : > { %v338_v22 = vadd.f32 %v877_v9, %v299_v14  ;;  %v339_v23 = vadd.f32 %v877_v9, %v300_v15  ;;  %v340_v24 = vadd.f32 %v877_v9, %v301_v16  ;;  %v341_v25 = vadd.f32 %v877_v9, %v302_v17  ;;  %p710_p3 = por %p709_p2, %p708_p1 }
  0x1e   : > { %v342_v26 = vadd.f32 %v877_v9, %v303_v18  ;;  %v343_v27 = vadd.f32 %v877_v9, %v304_v19  ;;  %v344_v28 = vadd.f32 %v877_v9, %v305_v20  ;;  %v345_v29 = vadd.f32 %v877_v9, %v306_v21 }
  0x1f   : > { %v370_v32 = vmax.f32 %v338_v22, 0.0  ;;  %v371_v33 = vmax.f32 %v339_v23, 0.0  ;;  %v372_v34 = vmax.f32 %v340_v24, 0.0  ;;  %v373_v35 = vmax.f32 %v341_v25, 0.0  ;;  %p711_p5 = pnand %p710_p3, %p704_p0 }
  0x20   : > { %v374_v38 = vmax.f32 %v342_v26, 0.0  ;;  %v375_v39 = vmax.f32 %v343_v27, 0.0  ;;  %v376_v40 = vmax.f32 %v344_v28, 0.0  ;;  %v377_v41 = vmax.f32 %v345_v29, 0.0 }
  0x21   : > { %403 = vst.msk [vmem:[%s901_s18] sm:$0xff] %vm402_vm0, %v370_v32  ;;  %404 = vst.msk [vmem:[%s901_s18 + $0x8] sm:$0xff] %vm402_vm0, %v371_v33  ;;  %v583_v42 = vunpack.c.l.bf16 %v632_v30  ;;  %v584_v43 = vunpack.c.h.bf16 %v632_v30  ;;  %v587_v44 = vunpack.c.l.bf16 %v633_v31  ;;  %v588_v45 = vunpack.c.h.bf16 %v633_v31 }
  0x22   : > { %405 = vst.msk [vmem:[%s901_s18 + $0x10] sm:$0xff] %vm402_vm0, %v372_v34  ;;  %406 = vst.msk [vmem:[%s901_s18 + $0x18] sm:$0xff] %vm402_vm0, %v373_v35  ;;  %v591_v46 = vunpack.c.l.bf16 %v634_v36  ;;  %v592_v47 = vunpack.c.h.bf16 %v634_v36  ;;  %v595_v48 = vunpack.c.l.bf16 %v635_v37  ;;  %v596_v49 = vunpack.c.h.bf16 %v635_v37 }
  0x23   : > { %407 = vst.msk [vmem:[%s901_s18 + $0x20] sm:$0xff] %vm402_vm0, %v374_v38  ;;  %408 = vst.msk [vmem:[%s901_s18 + $0x28] sm:$0xff] %vm402_vm0, %v375_v39  ;;  %v307_v50 = vmul.f32 %v583_v42, %v872_v1  ;;  %v308_v51 = vmul.f32 %v584_v43, %v872_v1  ;;  %v309_v52 = vmul.f32 %v587_v44, %v872_v1  ;;  %v599_v16 = vunpack.c.l.bf16 %v636_v3 }
  0x24   : > { %409 = vst.msk [vmem:[%s901_s18 + $0x30] sm:$0xff] %vm402_vm0, %v376_v40  ;;  %410 = vst.msk [vmem:[%s901_s18 + $0x38] sm:$0xff] %vm402_vm0, %v377_v41  ;;  %v310_v53 = vmul.f32 %v588_v45, %v872_v1  ;;  %v311_v54 = vmul.f32 %v591_v46, %v872_v1  ;;  %v312_v55 = vmul.f32 %v592_v47, %v872_v1  ;;  %v600_v17 = vunpack.c.h.bf16 %v636_v3  ;;  %v640_v40 = vld [vmem:[%s865_s6 + $0x60] sm:$0xff]   ;;  %v641_v41 = vld [vmem:[%s865_s6 + $0x68] sm:$0xff]  }
  0x25   : > { %v313_v56 = vmul.f32 %v595_v48, %v872_v1  ;;  %v314_v57 = vmul.f32 %v596_v49, %v872_v1  ;;  %v346_v58 = vadd.f32 %v877_v9, %v307_v50  ;;  %v347_v59 = vadd.f32 %v877_v9, %v308_v51  ;;  %v642_v46 = vld [vmem:[%s865_s6 + $0x70] sm:$0xff]   ;;  %v643_v47 = vld [vmem:[%s865_s6 + $0x78] sm:$0xff]  }
  0x26   : > { %v348_v60 = vadd.f32 %v877_v9, %v309_v52  ;;  %v349_v61 = vadd.f32 %v877_v9, %v310_v53  ;;  %v350_v62 = vadd.f32 %v877_v9, %v311_v54  ;;  %v351_v63 = vadd.f32 %v877_v9, %v312_v55 }
  0x27   : > { %v352_v0 = vadd.f32 %v877_v9, %v313_v56  ;;  %v353_v2 = vadd.f32 %v877_v9, %v314_v57  ;;  %v378_v5 = vmax.f32 %v346_v58, 0.0  ;;  %v379_v6 = vmax.f32 %v347_v59, 0.0 }
  0x28   : > { %v380_v7 = vmax.f32 %v348_v60, 0.0  ;;  %v381_v8 = vmax.f32 %v349_v61, 0.0  ;;  %v382_v12 = vmax.f32 %v350_v62, 0.0  ;;  %v383_v13 = vmax.f32 %v351_v63, 0.0 }
  0x29   : > { %v384_v14 = vmax.f32 %v352_v0, 0.0  ;;  %v385_v15 = vmax.f32 %v353_v2, 0.0  ;;  %411 = vst.msk [vmem:[%s901_s18 + $0x40] sm:$0xff] %vm402_vm0, %v378_v5  ;;  %412 = vst.msk [vmem:[%s901_s18 + $0x48] sm:$0xff] %vm402_vm0, %v379_v6  ;;  %v603_v18 = vunpack.c.l.bf16 %v637_v4  ;;  %v604_v19 = vunpack.c.h.bf16 %v637_v4 }
  0x2a   : > { %413 = vst.msk [vmem:[%s901_s18 + $0x50] sm:$0xff] %vm402_vm0, %v380_v7  ;;  %414 = vst.msk [vmem:[%s901_s18 + $0x58] sm:$0xff] %vm402_vm0, %v381_v8  ;;  %v607_v20 = vunpack.c.l.bf16 %v638_v10  ;;  %v608_v21 = vunpack.c.h.bf16 %v638_v10  ;;  %v611_v22 = vunpack.c.l.bf16 %v639_v11  ;;  %v612_v23 = vunpack.c.h.bf16 %v639_v11 }
  0x2b   : > { %415 = vst.msk [vmem:[%s901_s18 + $0x60] sm:$0xff] %vm402_vm0, %v382_v12  ;;  %416 = vst.msk [vmem:[%s901_s18 + $0x68] sm:$0xff] %vm402_vm0, %v383_v13  ;;  %v315_v24 = vmul.f32 %v599_v16, %v872_v1  ;;  %v316_v25 = vmul.f32 %v600_v17, %v872_v1  ;;  %v317_v26 = vmul.f32 %v603_v18, %v872_v1  ;;  %v615_v52 = vunpack.c.l.bf16 %v640_v40 }
  0x2c   : > { %417 = vst.msk [vmem:[%s901_s18 + $0x70] sm:$0xff] %vm402_vm0, %v384_v14  ;;  %418 = vst.msk [vmem:[%s901_s18 + $0x78] sm:$0xff] %vm402_vm0, %v385_v15  ;;  %v318_v27 = vmul.f32 %v604_v19, %v872_v1  ;;  %v319_v28 = vmul.f32 %v607_v20, %v872_v1  ;;  %v320_v29 = vmul.f32 %v608_v21, %v872_v1  ;;  %v616_v53 = vunpack.c.h.bf16 %v640_v40 }
  0x2d   : > { %v321_v30 = vmul.f32 %v611_v22, %v872_v1  ;;  %v322_v31 = vmul.f32 %v612_v23, %v872_v1  ;;  %v354_v32 = vadd.f32 %v877_v9, %v315_v24  ;;  %v355_v33 = vadd.f32 %v877_v9, %v316_v25 }
  0x2e   : > { %v356_v34 = vadd.f32 %v877_v9, %v317_v26  ;;  %v357_v35 = vadd.f32 %v877_v9, %v318_v27  ;;  %v358_v36 = vadd.f32 %v877_v9, %v319_v28  ;;  %v359_v37 = vadd.f32 %v877_v9, %v320_v29 }
  0x2f   : > { %v360_v38 = vadd.f32 %v877_v9, %v321_v30  ;;  %v361_v39 = vadd.f32 %v877_v9, %v322_v31  ;;  %v386_v42 = vmax.f32 %v354_v32, 0.0  ;;  %v387_v43 = vmax.f32 %v355_v33, 0.0 }
  0x30   : > { %v388_v44 = vmax.f32 %v356_v34, 0.0  ;;  %v389_v45 = vmax.f32 %v357_v35, 0.0  ;;  %v390_v48 = vmax.f32 %v358_v36, 0.0  ;;  %v391_v49 = vmax.f32 %v359_v37, 0.0 }
  0x31   : > { %v392_v50 = vmax.f32 %v360_v38, 0.0  ;;  %v393_v51 = vmax.f32 %v361_v39, 0.0  ;;  %419 = vst.msk [vmem:[%s901_s18 + $0x80] sm:$0xff] %vm402_vm0, %v386_v42  ;;  %420 = vst.msk [vmem:[%s901_s18 + $0x88] sm:$0xff] %vm402_vm0, %v387_v43  ;;  %v619_v54 = vunpack.c.l.bf16 %v641_v41  ;;  %v620_v55 = vunpack.c.h.bf16 %v641_v41 }
  0x32   : > { %421 = vst.msk [vmem:[%s901_s18 + $0x90] sm:$0xff] %vm402_vm0, %v388_v44  ;;  %422 = vst.msk [vmem:[%s901_s18 + $0x98] sm:$0xff] %vm402_vm0, %v389_v45  ;;  %v623_v56 = vunpack.c.l.bf16 %v642_v46  ;;  %v624_v57 = vunpack.c.h.bf16 %v642_v46  ;;  %v627_v58 = vunpack.c.l.bf16 %v643_v47  ;;  %v628_v59 = vunpack.c.h.bf16 %v643_v47 }
  0x33   : > { %423 = vst.msk [vmem:[%s901_s18 + $0xa0] sm:$0xff] %vm402_vm0, %v390_v48  ;;  %424 = vst.msk [vmem:[%s901_s18 + $0xa8] sm:$0xff] %vm402_vm0, %v391_v49  ;;  %v323_v60 = vmul.f32 %v615_v52, %v872_v1  ;;  %v324_v61 = vmul.f32 %v616_v53, %v872_v1  ;;  %v325_v62 = vmul.f32 %v619_v54, %v872_v1 }
  0x34   : > { %425 = vst.msk [vmem:[%s901_s18 + $0xb0] sm:$0xff] %vm402_vm0, %v392_v50  ;;  %426 = vst.msk [vmem:[%s901_s18 + $0xb8] sm:$0xff] %vm402_vm0, %v393_v51  ;;  %v326_v63 = vmul.f32 %v620_v55, %v872_v1  ;;  %v327_v0 = vmul.f32 %v623_v56, %v872_v1  ;;  %v328_v2 = vmul.f32 %v624_v57, %v872_v1 }
  0x35   : > { %v329_v3 = vmul.f32 %v627_v58, %v872_v1  ;;  %v330_v4 = vmul.f32 %v628_v59, %v872_v1  ;;  %v362_v5 = vadd.f32 %v877_v9, %v323_v60  ;;  %v363_v6 = vadd.f32 %v877_v9, %v324_v61 }
  0x36   : > { %v364_v7 = vadd.f32 %v877_v9, %v325_v62  ;;  %v365_v8 = vadd.f32 %v877_v9, %v326_v63  ;;  %v366_v10 = vadd.f32 %v877_v9, %v327_v0  ;;  %v367_v11 = vadd.f32 %v877_v9, %v328_v2 }
  0x37   : > { %v368_v1 = vadd.f32 %v877_v9, %v329_v3  ;;  %v369_v12 = vadd.f32 %v877_v9, %v330_v4  ;;  %v394_v13 = vmax.f32 %v362_v5, 0.0  ;;  %v395_v14 = vmax.f32 %v363_v6, 0.0 }
  0x38   : > { %v396_v15 = vmax.f32 %v364_v7, 0.0  ;;  %v397_v16 = vmax.f32 %v365_v8, 0.0  ;;  %v398_v17 = vmax.f32 %v366_v10, 0.0  ;;  %v399_v9 = vmax.f32 %v367_v11, 0.0 }
  0x39   : > { %v400_v18 = vmax.f32 %v368_v1, 0.0  ;;  %v401_v19 = vmax.f32 %v369_v12, 0.0  ;;  %427 = vst.msk [vmem:[%s901_s18 + $0xc0] sm:$0xff] %vm402_vm0, %v394_v13  ;;  %428 = vst.msk [vmem:[%s901_s18 + $0xc8] sm:$0xff] %vm402_vm0, %v395_v14 }
  0x3a   : > { %429 = vst.msk [vmem:[%s901_s18 + $0xd0] sm:$0xff] %vm402_vm0, %v396_v15  ;;  %430 = vst.msk [vmem:[%s901_s18 + $0xd8] sm:$0xff] %vm402_vm0, %v397_v16 }
  0x3b   : > { %431 = vst.msk [vmem:[%s901_s18 + $0xe0] sm:$0xff] %vm402_vm0, %v398_v17  ;;  %432 = vst.msk [vmem:[%s901_s18 + $0xe8] sm:$0xff] %vm402_vm0, %v399_v9 }
  0x3c   : > { %433 = vst.msk [vmem:[%s901_s18 + $0xf0] sm:$0xff] %vm402_vm0, %v400_v18  ;;  %434 = vst.msk [vmem:[%s901_s18 + $0xf8] sm:$0xff] %vm402_vm0, %v401_v19 }
  0x3d   : > { %714 = shalt.err (!%p711_p5)
}
  0x3e   : > { %s715_s5 = scalar_lea.hbm %s1012_s26, 4096  ;;  %s719_s8 = scalar_lea.hbm %s1082_s3, 8192 }
  0x3f   : > { %p716_p6 = scmp.ne.s32.totalorder %s1012_s26, %s715_s5  ;;  %p720_p10 = scmp.lt.s32.totalorder %s1012_s26, %s1082_s3 }
  0x40   : > { %p721_p11 = scmp.lt.s32.totalorder %s719_s8, %s715_s5 }
  0x41   : > { %p717_p7 = pnand %p716_p6, %p842_p4 }
  0x42   : > { %p722_p12 = por %p721_p11, %p720_p10 }
  0x43   : > { %p718_p9 = pneg %p717_p7 }
  0x45   : > { %p723_p13 = pnand %p722_p12, %p718_p9 }
  0x47   : > { %726 = shalt.err (!%p723_p13)
}
  0x48   : > { %s780_s11 = smov 128   ;;  %s781_s18 = smov 8  }
  0x49   : > { %644 = dma.vmem_to_hbm [thread:$0]  (%p842_p4), %s1014_s21, 4096, %s1012_s26, %s1034_s27, %s780_s11, %s780_s11, %s781_s18  }
  0x4a PF: > { %p650_p0 = scmp.ge.s32.totalorder %s777_s17, 2  ;;  %s466_s19 = sand.u32 1, %s757_s12  }
  0x4b   : > { %s467_s15 = scalar_lea.sflag [#allocation3], %s466_s19 }
  0x4c   : > { %p647_p1 = pnand %p650_p0, %p849_p8 }
  0x4e   : > { %p648_p2 = pneg %p647_p1 }
  0x50   : > { %752 = dma.done.wait (%p648_p2), %s467_s15, 4096  }
  0x51   : > { %754 = vsyncadd (%p648_p2), %s467_s15, 4294963200  ;;  %s16_s17 = sadd.s32 1, %s777_s17   ;;  %s1085_s12 = smov %s761_s13 }
  0x52   : > { %p13_p3 = scmp.ge.s32.totalorder %s16_s17, 4   ;;  %s1086_s13 = smov %s765_s14 }
  0x53   : > { %s1087_s14 = smov %s855_s25  ;;  %s1088_s15 = smov %s773_s16 }
  0x54   : > { %s1089_s16 = smov %s1091_s20  ;;  %15 = sbr.rel (!%p13_p3) target bundleno = 4 (0x4), region = 73 }
  0x59   :  { %472 = vsyncpa [#allocation3], 1 }
  0x5a   :  { %474 = vsyncpa [#allocation3 + $0x1], 1 }

// kernel: conv_module_forward.3
= control target key start
LH: loop header
LB: loop body
LE: loop exit
PB: predicated region body
PF: predicated region fallthrough
CT: control target
= control target key end

     0   :  { %s2178_s15 = smov 0   ;;  %s2180_s16 = smov 0   ;;  %s2997_s0 = inlined_call_operand.vmem [shape: bf16[2,24,18,4], index: 0, kind: input, shape index: {}, may-alias: {0,1}]   ;;  %s2998_s1 = inlined_call_operand.vmem [shape: bf16[2,24,18,4], index: 1, kind: input, shape index: {}, may-alias: {0,1}]   ;;  %s2999_s2 = inlined_call_operand.vmem [shape: bf16[36,32], index: 2, kind: input, shape index: {}]   ;;  %s3000_s3 = inlined_call_operand.vmem [shape: f32[1,32], index: 3, kind: input, shape index: {}]   ;;  %s3001_s4 = inlined_call_operand.vmem [shape: bf16[2,16,16,32], index: 4, kind: output, shape index: {}]  }
   0x1   :  { %s2182_s17 = smov 0  }
   0x2 LB: > { %s26_s18 = sadd.s32 1, %s2139_s16  ;;  %p1850_p0 = scmp.ge.s32.totalorder %s2143_s17, 1  ;;  %s2143_s17 = sphi %s2182_s17, %s14_s17   ;;  %s2139_s16 = sphi %s2180_s16, %s3003_s16   ;;  %s2135_s15 = sphi %s2178_s15, %s3002_s15  }
   0x3   : > { %p28_p1 = scmp.ge.s32.totalorder %s26_s18, 2  ;;  %p220_p2 = scmp.lt.s32.totalorder %s2143_s17, 3 }
   0x5   : > { %s3005_s18 = smov (%p28_p1, %s26_s18), 0  ;;  %p221_p3 = pnand %p1850_p0, %p220_p2 }
   0x6   : > { %p279_p4 = scmp.lt.s32.totalorder (!%p221_p3), %s2135_s15, 1  ;;  %s2145_s23 = smov (!%p221_p3), 12  }
   0x7   : > { %224 = sbr.rel (%p221_p3) target bundleno = 590 (0x24e), region = 36  ;;  %s2146_s24 = smov (!%p221_p3), 8  }
   0x8   : > { %s2147_s25 = smov (!%p221_p3), 4   ;;  %s2148_s26 = smov (!%p221_p3), 16  }
   0x9   : > { %s2149_s27 = smov (!%p221_p3), 20   ;;  %s2150_s28 = smov (!%p221_p3), 24  }
   0xa   : > { %s2151_s7 = smov (!%p221_p3), 28   ;;  %s2152_s10 = smov (!%p221_p3), 32  }
   0xc   : > { %s3007_s15 = smov (!%p279_p4, %s2135_s15), 1  ;;  %vm728_vm0 = vcmask 1046528   ;;  %vm503_vm1 = vsmask.f32 7424  ;;  %vm1364_vm2 = vcmask 1041408   ;;  %vm1047_vm3 = vcmask 31744  }
   0xd   : > { %s2045_s19 = smul.u32 288, %s3007_s15  ;;  %vm1080_vm4 = vcmask 64512   ;;  %vm1146_vm5 = vcmask 130048   ;;  %vm1113_vm6 = vcmask 97280   ;;  %vm1179_vm7 = vcmask 162816   ;;  %s1947_s21 = sshll.u32 %s3007_s15, 7 }
   0xe   : > { %vm1212_vm8 = vcmask 195584   ;;  %vm1245_vm9 = vcmask 228352   ;;  %vm1278_vm10 = vcmask 261120   ;;  %vm1331_vm11 = vcmask 293888  }
   0xf   : > { %s2204_s22 = scalar_lea.vmem %s2997_s0, %s2045_s19  ;;  %s1946_s11 = sadd.s32 192, %s2045_s19  ;;  %vm1696_vm12 = vcmask 257024  }
  0x10   : > { %v2207_v0 = vld [vmem:[%s2204_s22 + $0x6c] sm:$0xff]   ;;  %v2217_v2 = vld [vmem:[%s2204_s22 + $0x60] sm:$0xff]   ;;  %v2083_v3 = vld [vmem:[%s2204_s22 + $0x68] ss:$0 sps:$4 sm:$0x11]   ;;  %s2390_s14 = scalar_lea.vmem %s2998_s1, %s1946_s11 }
  0x11   : > { %v2210_v1 = vld [vmem:[%s2204_s22 + $0xc] sm:$0xff]   ;;  %830 = vrot.lane.b32.xlu1 %v2207_v0, %s2145_s23  ;;  %v2221_v4 = vld [vmem:[%s2204_s22] sm:$0xff]   ;;  %v756_v5 = vrot.slane %v2207_v0, 1  ;;  %v753_v6 = vrot.slane %v2217_v2, 1  ;;  %v754_v7 = vrot.slane %v2083_v3, 1  ;;  %v613_v26 = vshrl.u32 %v2207_v0, 16 }
  0x12   : > { %814 = vrot.lane.b32.xlu0 %v2210_v1, %s2145_s23  ;;  %v2085_v8 = vld [vmem:[%s2204_s22 + $0x8] ss:$0 sps:$4 sm:$0x11]   ;;  %v732_v9 = vrot.slane %v2210_v1, 1  ;;  %v729_v10 = vrot.slane %v2221_v4, 1  ;;  %v517_v16 = vshrl.u32 %v2210_v1, 16 }
  0x13   : > { %v2086_v11 = vld [vmem:[%s2204_s22 + $0x74] ss:$0 sps:$4 sm:$0x11]   ;;  %v2230_v12 = vsel %vm728_vm0, %v753_v6, %v754_v7  ;;  %v730_v13 = vrot.slane %v2085_v8, 1  ;;  %v519_v17 = vshll.u32 %v2210_v1, 16  ;;  %v505_v18 = vshrl.u32 %v2221_v4, 16 }
  0x14   : > { %v2087_v14 = vld [vmem:[%s2204_s22 + $0x14] ss:$0 sps:$4 sm:$0x11]   ;;  %v757_v15 = vrot.slane %v2086_v11, 1  ;;  %v507_v22 = vshll.u32 %v2221_v4, 16  ;;  %v512_v25 = vshll.u32 %v2085_v8, 16 }
  0x15   : > { %793 = vrot.lane.b32.xlu1 %v2230_v12, %s2146_s24  ;;  %v731_v19 = vsel %vm728_vm0, %v729_v10, %v730_v13  ;;  %v733_v20 = vrot.slane %v2087_v14, 1  ;;  %v524_v21 = vshll.u32 %v2087_v14, 16  ;;  %v521_v24 = vrot.slane %v519_v17, 1  ;;  %v2252_v39 = vld [vmem:[%s2204_s22 + $0x78] sm:$0xff]   ;;  %v2310_v14 = vld [vmem:[%s2204_s22 + $0x24] sm:$0xff]  }
  0x16   : > { %777 = vrot.lane.b32.xlu0 %v731_v19, %s2146_s24  ;;  %v2242_v23 = vsel %vm728_vm0, %v756_v5, %v757_v15  ;;  %v509_v29 = vrot.slane %v507_v22, 1  ;;  %v615_v30 = vshll.u32 %v2207_v0, 16  ;;  %v514_v32 = vrot.slane %v512_v25, 1  ;;  %v2258_v46 = vld [vmem:[%s2204_s22 + $0x18] sm:$0xff]  }
  0x17   : > { %v734_v27 = vsel %vm728_vm0, %v732_v9, %v733_v20  ;;  %v526_v28 = vrot.slane %v524_v21, 1  ;;  %v522_v31 = vor.u32 %v521_v24, %v517_v16  ;;  %v620_v33 = vshll.u32 %v2086_v11, 16  ;;  %v2090_v47 = vld [vmem:[%s2204_s22 + $0x80] ss:$0 sps:$4 sm:$0x11]   ;;  %v2303_v11 = vld [vmem:[%s2204_s22 + $0x84] sm:$0xff]  }
  0x18   : > { %v601_v34 = vshrl.u32 %v2217_v2, 16  ;;  %v510_v35 = vor.u32 %v509_v29, %v505_v18  ;;  %v617_v36 = vrot.slane %v615_v30, 1  ;;  %v603_v37 = vshll.u32 %v2217_v2, 16  ;;  %v2091_v52 = vld [vmem:[%s2204_s22 + $0x20] ss:$0 sps:$4 sm:$0x11]  }
  0x19   : > { %795 = vrot.lane.b32.xlu1 %v2242_v23, %s2146_s24  ;;  %v608_v38 = vshll.u32 %v2083_v3, 16  ;;  %v527_v40 = vsel %vm503_vm1, %v522_v31, %v526_v28  ;;  %v622_v41 = vrot.slane %v620_v33, 1  ;;  %v627_v50 = vshll.u32 %v2252_v39, 16  ;;  %v2094_v15 = vld [vmem:[%s2204_s22 + $0x8c] ss:$0 sps:$4 sm:$0x11]  }
  0x1a   : > { %779 = vrot.lane.b32.xlu0 %v734_v27, %s2146_s24  ;;  %v515_v42 = vsel %vm503_vm1, %v510_v35, %v514_v32  ;;  %v618_v43 = vor.u32 %v617_v36, %v613_v26  ;;  %v605_v44 = vrot.slane %v603_v37, 1  ;;  %v531_v53 = vshll.u32 %v2258_v46, 16  ;;  %v2095_v17 = vld [vmem:[%s2204_s22 + $0x2c] ss:$0 sps:$4 sm:$0x11]   ;;  %v2112_v33 = vld [vmem:[%s2999_s2] sm:$0xff]  }
  0x1b   : > { %v610_v45 = vrot.slane %v608_v38, 1  ;;  %v625_v54 = vshrl.u32 %v2252_v39, 16  ;;  %v629_v55 = vrot.slane %v627_v50, 1  ;;  %v632_v56 = vshll.u32 %v2090_v47, 16  ;;  %v2109_v28 = vld [vmem:[%s2999_s2 + $0x8] sm:$0xff]  }
  0x1c   : > { %v2263_v48 = vsel %vm503_vm1, %v618_v43, %v622_v41  ;;  %v606_v49 = vor.u32 %v605_v44, %v601_v34  ;;  %v529_v57 = vshrl.u32 %v2258_v46, 16  ;;  %v533_v58 = vrot.slane %v531_v53, 1  ;;  %v2108_v19 = vld [vmem:[%s2999_s2 + $0x10] ss:$0 sps:$4 sm:$0x33]  }
  0x1d   : > { %698 = vrot.lane.b32.xlu1 %v527_v40, %s2147_s25  ;;  %v536_v59 = vshll.u32 %v2091_v52, 16  ;;  %v630_v60 = vor.u32 %v629_v55, %v625_v54  ;;  %v634_v61 = vrot.slane %v632_v56, 1  ;;  %v759_v6 = vrot.slane %v2252_v39, 1  ;;  %2043 = vmatprep.subr.msk.bf16.mxu0 %vm1364_vm2, %v2108_v19  ;;  %v2366_v43 = vld [vmem:[%s2204_s22 + $0x90] sm:$0xff]  }
  0x1e   : > { %696 = vrot.lane.b32.xlu0 %v515_v42, %s2147_s25  ;;  %v2268_v51 = vsel %vm503_vm1, %v606_v49, %v610_v45  ;;  %v534_v62 = vor.u32 %v533_v58, %v529_v57  ;;  %v760_v7 = vrot.slane %v2090_v47, 1  ;;  %v735_v8 = vrot.slane %v2258_v46, 1  ;;  %2044 = vmatprep.subr.msk.bf16.mxu1 %vm1364_vm2, %v2108_v19  ;;  %v2371_v44 = vld [vmem:[%s2204_s22 + $0x30] sm:$0xff]   ;;  %v2098_v45 = vld [vmem:[%s2204_s22 + $0x98] ss:$0 sps:$4 sm:$0x11]  }
  0x1f   : > { %v538_v63 = vrot.slane %v536_v59, 1  ;;  %v2285_v3 = vsel %vm503_vm1, %v630_v60, %v634_v61  ;;  %v736_v9 = vrot.slane %v2091_v52, 1  ;;  %v639_v16 = vshll.u32 %v2303_v11, 16  ;;  %v2099_v49 = vld [vmem:[%s2204_s22 + $0x38] ss:$0 sps:$4 sm:$0x11]  }
  0x20   : > { %v2300_v10 = vsel %vm728_vm0, %v759_v6, %v760_v7  ;;  %v543_v18 = vshll.u32 %v2310_v14, 16  ;;  %v637_v20 = vshrl.u32 %v2303_v11, 16  ;;  %v644_v22 = vshll.u32 %v2094_v15, 16 }
  0x21   : > { %714 = vrot.lane.b32.xlu1 %v2263_v48, %s2147_s25  ;;  %v2289_v5 = vsel %vm503_vm1, %v534_v62, %v538_v63  ;;  %v2307_v13 = vsel %vm728_vm0, %v735_v8, %v736_v9  ;;  %v641_v21 = vrot.slane %v639_v16, 1  ;;  %v1366_v24 = vsel %vm1364_vm2, %v2108_v19, 0  ;;  %v2407_v9 = vld [vmem:[%s2204_s22 + $0x9c] sm:$0xff]  }
  0x22   : > { %712 = vrot.lane.b32.xlu0 %v2268_v51, %s2147_s25  ;;  %v541_v25 = vshrl.u32 %v2310_v14, 16  ;;  %v545_v26 = vrot.slane %v543_v18, 1  ;;  %2000 = vmatpush3.bf16.msra.mxu0 %v1366_v24  ;;  %v646_v30 = vrot.slane %v644_v22, 1  ;;  %v762_v36 = vrot.slane %v2303_v11, 1 }
  0x23   : > { %2040 = vmatpush3.bf16.msra.mxu1 %v1366_v24  ;;  %v642_v29 = vor.u32 %v641_v21, %v637_v20  ;;  %2001 = vmatprep.subr.bf16.mxu0 %v2109_v28  ;;  %v763_v37 = vrot.slane %v2094_v15, 1  ;;  %v738_v38 = vrot.slane %v2310_v14, 1  ;;  %v651_v47 = vshll.u32 %v2366_v43, 16  ;;  %v2102_v15 = vld [vmem:[%s2204_s22 + $0xa4] ss:$0 sps:$4 sm:$0x11]  }
  0x24   : > { %v546_v31 = vor.u32 %v545_v26, %v541_v25  ;;  %2038 = vmatprep.subr.bf16.mxu1 %v2109_v28  ;;  %v555_v50 = vshll.u32 %v2371_v44, 16  ;;  %v656_v52 = vshll.u32 %v2098_v45, 16  ;;  %v649_v53 = vshrl.u32 %v2366_v43, 16 }
  0x25   : > { %832 = vrot.lane.b32.xlu1 %v2252_v39, %s2145_s23  ;;  %v647_v34 = vsel %vm503_vm1, %v642_v29, %v646_v30  ;;  %v764_v41 = vsel %vm728_vm0, %v762_v36, %v763_v37  ;;  %v653_v54 = vrot.slane %v651_v47, 1  ;;  %v553_v55 = vshrl.u32 %v2371_v44, 16 }
  0x26   : > { %816 = vrot.lane.b32.xlu0 %v2258_v46, %s2145_s23  ;;  %2002 = vmatpush3.bf16.msra.mxu0 %v2109_v28  ;;  %v557_v56 = vrot.slane %v555_v50, 1  ;;  %v560_v57 = vshll.u32 %v2099_v49, 16  ;;  %v658_v58 = vrot.slane %v656_v52, 1  ;;  %v741_v6 = vrot.slane %v2371_v44, 1 }
  0x27   : > { %2041 = vmatpush3.bf16.msra.mxu1 %v2109_v28  ;;  %2003 = vmatprep.subr.bf16.mxu0 %v2112_v33  ;;  %v654_v59 = vor.u32 %v653_v54, %v649_v53  ;;  %v742_v7 = vrot.slane %v2099_v49, 1  ;;  %v663_v16 = vshll.u32 %v2407_v9, 16  ;;  %v661_v19 = vshrl.u32 %v2407_v9, 16 }
  0x28   : > { %2039 = vmatprep.subr.bf16.mxu1 %v2112_v33  ;;  %v558_v60 = vor.u32 %v557_v56, %v553_v55  ;;  %v562_v61 = vrot.slane %v560_v57, 1  ;;  %v668_v21 = vshll.u32 %v2102_v15, 16  ;;  %v768_v36 = vrot.slane %v2407_v9, 1  ;;  %v2473_v56 = vld [vmem:[%s2204_s22 + $0xa8] sm:$0xff]  }
  0x29   : > { %877 = vrot.lane.b32.xlu1 %v2263_v48, %s2148_s26  ;;  %v659_v62 = vsel %vm503_vm1, %v654_v59, %v658_v58  ;;  %v665_v20 = vrot.slane %v663_v16, 1  ;;  %v769_v37 = vrot.slane %v2102_v15, 1  ;;  %v2479_v58 = vld [vmem:[%s2204_s22 + $0x48] sm:$0xff]  }
  0x2a   : > { %861 = vrot.lane.b32.xlu0 %v527_v40, %s2148_s26  ;;  %2004 = vmatpush3.bf16.msra.mxu0 %v2112_v33  ;;  %v739_v40 = vrot.slane %v2095_v17, 1  ;;  %v563_v63 = vsel %vm503_vm1, %v558_v60, %v562_v61  ;;  %v2106_v60 = vld [vmem:[%s2204_s22 + $0xb0] ss:$0 sps:$4 sm:$0x11]   ;;  %v675_v61 = vshll.u32 %v2473_v56, 16  ;;  %v577_v15 = vshrl.u32 %v2479_v58, 16 }
  0x2b   : > { %2042 = vmatpush3.bf16.msra.mxu1 %v2112_v33  ;;  %v666_v26 = vor.u32 %v665_v20, %v661_v19 }
  0x2c   : > { %v740_v42 = vsel %vm728_vm0, %v738_v38, %v739_v40 }
  0x2d   : > { %879 = vrot.lane.b32.xlu1 %v2285_v3, %s2148_s26 }
  0x2e   : > { %863 = vrot.lane.b32.xlu0 %v2289_v5, %s2148_s26 }
  0x31   : > { %912 = vrot.lane.b32.xlu1 %v2242_v23, %s2149_s27 }
  0x32   : > { %896 = vrot.lane.b32.xlu0 %v734_v27, %s2149_s27  ;;  %v548_v27 = vshll.u32 %v2095_v17, 16  ;;  %v2103_v17 = vld [vmem:[%s2204_s22 + $0x44] ss:$0 sps:$4 sm:$0x11]  }
  0x33   : > { %v572_v25 = vshll.u32 %v2103_v17, 16 }
  0x34   : > { %v550_v32 = vrot.slane %v548_v27, 1  ;;  %v670_v27 = vrot.slane %v668_v21, 1 }
  0x35   : > { %914 = vrot.lane.b32.xlu1 %v2300_v10, %s2149_s27  ;;  %v574_v29 = vrot.slane %v572_v25, 1 }
  0x36   : > { %898 = vrot.lane.b32.xlu0 %v2307_v13, %s2149_s27  ;;  %v551_v35 = vsel %vm503_vm1, %v546_v31, %v550_v32  ;;  %v671_v31 = vsel %vm503_vm1, %v666_v26, %v670_v27 }
  0x39   : > { %949 = vrot.lane.b32.xlu1 %v2252_v39, %s2150_s28 }
  0x3a   : > { %933 = vrot.lane.b32.xlu0 %v2258_v46, %s2150_s28 }
  0x3d   : > { %951 = vrot.lane.b32.xlu1 %v2303_v11, %s2150_s28 }
  0x3e   : > { %935 = vrot.lane.b32.xlu0 %v2310_v14, %s2150_s28 }
  0x41   : > { %996 = vrot.lane.b32.xlu1 %v2285_v3, %s2151_s7 }
  0x42   : > { %980 = vrot.lane.b32.xlu0 %v2289_v5, %s2151_s7 }
  0x45   : > { %998 = vrot.lane.b32.xlu1 %v647_v34, %s2151_s7 }
  0x46   : > { %982 = vrot.lane.b32.xlu0 %v551_v35, %s2151_s7 }
  0x49   : > { %1031 = vrot.lane.b32.xlu1 %v2300_v10, %s2152_s10 }
  0x4a   : > { %1015 = vrot.lane.b32.xlu0 %v2307_v13, %s2152_s10 }
  0x4d   : > { %716 = vrot.lane.b32.xlu1 %v2285_v3, %s2147_s25  ;;  %v765_v3 = vrot.slane %v2366_v43, 1 }
  0x4e   : > { %700 = vrot.lane.b32.xlu0 %v2289_v5, %s2147_s25  ;;  %v766_v5 = vrot.slane %v2098_v45, 1  ;;  %v770_v45 = vsel %vm728_vm0, %v768_v36, %v769_v37  ;;  %v771_v36 = vrot.slane %v2473_v56, 1  ;;  %v772_v37 = vrot.slane %v2106_v60, 1 }
  0x50   : > { %v767_v8 = vsel %vm728_vm0, %v765_v3, %v766_v5  ;;  %v579_v3 = vshll.u32 %v2479_v58, 16 }
  0x51   : > { %1033 = vrot.lane.b32.xlu1 %v764_v41, %s2152_s10 }
  0x52   : > { %1017 = vrot.lane.b32.xlu0 %v740_v42, %s2152_s10  ;;  %v581_v16 = vrot.slane %v579_v3, 1  ;;  %v2535_v3 = vld [vmem:[%s2204_s22 + $0xb4] sm:$0xff]  }
  0x55   : > { %718 = vrot.lane.b32.xlu1 %v647_v34, %s2147_s25 }
  0x56   : > { %702 = vrot.lane.b32.xlu0 %v551_v35, %s2147_s25 }
  0x59   : > { %797 = vrot.lane.b32.xlu1 %v2300_v10, %s2146_s24  ;;  %v743_v10 = vsel %vm728_vm0, %v741_v6, %v742_v7  ;;  %v673_v6 = vshrl.u32 %v2473_v56, 16  ;;  %v677_v7 = vrot.slane %v675_v61, 1 }
  0x5a   : > { %781 = vrot.lane.b32.xlu0 %v2307_v13, %s2146_s24  ;;  %v2412_v13 = vld [vmem:[%s2204_s22 + $0x3c] sm:$0xff]  }
  0x5b   : > { %v567_v18 = vshll.u32 %v2412_v13, 16  ;;  %v565_v22 = vshrl.u32 %v2412_v13, 16  ;;  %v744_v40 = vrot.slane %v2412_v13, 1  ;;  %v678_v19 = vor.u32 %v677_v7, %v673_v6 }
  0x5d   : > { %799 = vrot.lane.b32.xlu1 %v764_v41, %s2146_s24  ;;  %v569_v24 = vrot.slane %v567_v18, 1 }
  0x5e   : > { %783 = vrot.lane.b32.xlu0 %v740_v42, %s2146_s24 }
  0x5f   : > { %v570_v28 = vor.u32 %v569_v24, %v565_v22  ;;  %v582_v22 = vor.u32 %v581_v16, %v577_v15 }
  0x61   : > { %834 = vrot.lane.b32.xlu1 %v2303_v11, %s2145_s23  ;;  %v575_v33 = vsel %vm503_vm1, %v570_v28, %v574_v29 }
  0x62   : > { %818 = vrot.lane.b32.xlu0 %v2310_v14, %s2145_s23 }
  0x65   : > { %836 = vrot.lane.b32.xlu1 %v2366_v43, %s2145_s23 }
  0x66   : > { %820 = vrot.lane.b32.xlu0 %v2371_v44, %s2145_s23 }
  0x69   : > { %881 = vrot.lane.b32.xlu1 %v647_v34, %s2148_s26 }
  0x6a   : > { %865 = vrot.lane.b32.xlu0 %v551_v35, %s2148_s26 }
  0x6d   : > { %883 = vrot.lane.b32.xlu1 %v659_v62, %s2148_s26 }
  0x6e   : > { %867 = vrot.lane.b32.xlu0 %v563_v63, %s2148_s26 }
  0x71   : > { %916 = vrot.lane.b32.xlu1 %v764_v41, %s2149_s27  ;;  %v745_v41 = vrot.slane %v2103_v17, 1 }
  0x72   : > { %900 = vrot.lane.b32.xlu0 %v740_v42, %s2149_s27 }
  0x73   : > { %v2458_v49 = vsel %vm728_vm0, %v744_v40, %v745_v41 }
  0x75   : > { %918 = vrot.lane.b32.xlu1 %v767_v8, %s2149_s27 }
  0x76   : > { %902 = vrot.lane.b32.xlu0 %v743_v10, %s2149_s27 }
  0x79   : > { %953 = vrot.lane.b32.xlu1 %v2366_v43, %s2150_s28 }
  0x7a   : > { %937 = vrot.lane.b32.xlu0 %v2371_v44, %s2150_s28 }
  0x7d   : > { %955 = vrot.lane.b32.xlu1 %v2407_v9, %s2150_s28 }
  0x7e   : > { %939 = vrot.lane.b32.xlu0 %v2412_v13, %s2150_s28 }
  0x81   : > { %1000 = vrot.lane.b32.xlu1 %v659_v62, %s2151_s7 }
  0x82   : > { %984 = vrot.lane.b32.xlu0 %v563_v63, %s2151_s7 }
  0x83   : > { %v2431_v30 = vpop.permute.xlu1 %830 }
  0x84   : > { %v2435_v32 = vpop.permute.xlu0 %814 }
  0x85   : > { %1002 = vrot.lane.b32.xlu1 %v671_v31, %s2151_s7 }
  0x86   : > { %986 = vrot.lane.b32.xlu0 %v575_v33, %s2151_s7 }
  0x87   : > { %v2440_v34 = vpop.permute.xlu1 %793 }
  0x88   : > { %v2442_v35 = vpop.permute.xlu0 %777 }
  0x89   : > { %1035 = vrot.lane.b32.xlu1 %v767_v8, %s2152_s10 }
  0x8a   : > { %1019 = vrot.lane.b32.xlu0 %v743_v10, %s2152_s10 }
  0x8b   : > { %v2447_v38 = vpop.permute.xlu1 %795 }
  0x8c   : > { %v2450_v42 = vpop.permute.xlu0 %779 }
  0x8d   : > { %720 = vrot.lane.b32.xlu1 %v659_v62, %s2147_s25 }
  0x8e   : > { %704 = vrot.lane.b32.xlu0 %v563_v63, %s2147_s25  ;;  %v2107_v63 = vld [vmem:[%s2204_s22 + $0x50] ss:$0 sps:$4 sm:$0x11]  }
  0x8f   : > { %v2455_v47 = vpop.permute.xlu1 %698  ;;  %v584_v17 = vshll.u32 %v2107_v63, 16  ;;  %v748_v40 = vrot.slane %v2107_v63, 1 }
  0x90   : > { %v697_v50 = vpop.permute.xlu0 %696 }
  0x91   : > { %1037 = vrot.lane.b32.xlu1 %v770_v45, %s2152_s10  ;;  %v586_v24 = vrot.slane %v584_v17, 1  ;;  %v1049_v6 = vsel %vm1047_vm3, %v2221_v4, %v697_v50 }
  0x92   : > { %1021 = vrot.lane.b32.xlu0 %v2458_v49, %s2152_s10  ;;  %v1082_v4 = vsel %vm1080_vm4, %v1049_v6, %v2442_v35  ;;  %v2564_v35 = vld [vmem:[%s2204_s22 + $0x5c] ss:$0 sps:$4 sm:$0x11]  }
  0x93   : > { %v2463_v52 = vpop.permute.xlu1 %714  ;;  %v2516_v28 = vsel %vm503_vm1, %v582_v22, %v586_v24  ;;  %v685_v22 = vshrl.u32 %v2535_v3, 16 }
  0x94   : > { %v713_v53 = vpop.permute.xlu0 %712 }
  0x95   : > { %722 = vrot.lane.b32.xlu1 %v671_v31, %s2147_s25  ;;  %v1065_v41 = vsel %vm1047_vm3, %v2217_v2, %v713_v53 }
  0x96   : > { %706 = vrot.lane.b32.xlu0 %v575_v33, %s2147_s25  ;;  %v1098_v53 = vsel %vm1080_vm4, %v1065_v41, %v2440_v34  ;;  %v687_v34 = vshll.u32 %v2535_v3, 16 }
  0x97   : > { %v2467_v54 = vpop.permute.xlu1 %832  ;;  %v1131_v50 = vsel %vm1113_vm6, %v1098_v53, %v2431_v30  ;;  %v596_v53 = vshll.u32 %v2564_v35, 16 }
  0x98   : > { %v2469_v55 = vpop.permute.xlu0 %816 }
  0x99   : > { %801 = vrot.lane.b32.xlu1 %v767_v8, %s2146_s24  ;;  %v680_v8 = vshll.u32 %v2106_v60, 16  ;;  %v2532_v60 = vsel %vm728_vm0, %v771_v36, %v772_v37  ;;  %v689_v36 = vrot.slane %v687_v34, 1 }
  0x9a   : > { %785 = vrot.lane.b32.xlu0 %v743_v10, %s2146_s24 }
  0x9b   : > { %v2476_v57 = vpop.permute.xlu1 %877  ;;  %v682_v20 = vrot.slane %v680_v8, 1 }
  0x9c   : > { %v2481_v59 = vpop.permute.xlu0 %861  ;;  %v1164_v16 = vsel %vm1146_vm5, %v1131_v50, %v2476_v57 }
  0x9d   : > { %803 = vrot.lane.b32.xlu1 %v770_v45, %s2146_s24  ;;  %v2512_v26 = vsel %vm503_vm1, %v678_v19, %v682_v20  ;;  %v1115_v19 = vsel %vm1113_vm6, %v1082_v4, %v2435_v32  ;;  %v1067_v32 = vsel %vm1047_vm3, %v2207_v0, %v2463_v52  ;;  %v1051_v0 = vsel %vm1047_vm3, %v2210_v1, %v2455_v47 }
  0x9e   : > { %787 = vrot.lane.b32.xlu0 %v2458_v49, %s2146_s24  ;;  %v1148_v57 = vsel %vm1146_vm5, %v1115_v19, %v2481_v59  ;;  %v690_v4 = vor.u32 %v689_v36, %v685_v22  ;;  %v1084_v47 = vsel %vm1080_vm4, %v1051_v0, %v2450_v42 }
  0x9f   : > { %v2488_v62 = vpop.permute.xlu1 %879 }
  0xa0   : > { %v2492_v5 = vpop.permute.xlu0 %863 }
  0xa1   : > { %838 = vrot.lane.b32.xlu1 %v2407_v9, %s2145_s23 }
  0xa2   : > { %822 = vrot.lane.b32.xlu0 %v2412_v13, %s2145_s23 }
  0xa3   : > { %v913_v10 = vpop.permute.xlu1 %912 }
  0xa4   : > { %v2500_v18 = vpop.permute.xlu0 %896  ;;  %v1197_v20 = vsel %vm1179_vm7, %v1164_v16, %v913_v10  ;;  %v598_v16 = vrot.slane %v596_v53, 1  ;;  %v2115_v53 = vld [vmem:[%s2390_s14] sm:$0xff]  }
  0xa5   : > { %840 = vrot.lane.b32.xlu1 %v2473_v56, %s2145_s23  ;;  %v1181_v10 = vsel %vm1179_vm7, %v1148_v57, %v2500_v18 }
  0xa6   : > { %824 = vrot.lane.b32.xlu0 %v2479_v58, %s2145_s23 }
  0xa7   : > { %v2506_v21 = vpop.permute.xlu1 %914 }
  0xa8   : > { %v2508_v25 = vpop.permute.xlu0 %898 }
  0xa9   : > { %885 = vrot.lane.b32.xlu1 %v671_v31, %s2148_s26 }
  0xaa   : > { %869 = vrot.lane.b32.xlu0 %v575_v33, %s2148_s26  ;;  %v747_v33 = vrot.slane %v2479_v58, 1 }
  0xab   : > { %v950_v27 = vpop.permute.xlu1 %949 }
  0xac   : > { %v934_v29 = vpop.permute.xlu0 %933  ;;  %v2544_v7 = vsel %vm728_vm0, %v747_v33, %v748_v40  ;;  %v1230_v24 = vsel %vm1212_vm8, %v1197_v20, %v950_v27 }
  0xad   : > { %887 = vrot.lane.b32.xlu1 %v2512_v26, %s2148_s26  ;;  %v1214_v27 = vsel %vm1212_vm8, %v1181_v10, %v934_v29  ;;  %v1100_v29 = vsel %vm1080_vm4, %v1067_v32, %v2447_v38 }
  0xae   : > { %871 = vrot.lane.b32.xlu0 %v2516_v28, %s2148_s26  ;;  %v1133_v50 = vsel %vm1113_vm6, %v1100_v29, %v2467_v54  ;;  %v852_v29 = vshll.u32 %v2115_v53, 16 }
  0xaf   : > { %v2523_v31 = vpop.permute.xlu1 %951  ;;  %v1166_v38 = vsel %vm1146_vm5, %v1133_v50, %v2488_v62 }
  0xb0   : > { %v2528_v61 = vpop.permute.xlu0 %935  ;;  %v1199_v54 = vsel %vm1179_vm7, %v1166_v38, %v2506_v21 }
  0xb1   : > { %920 = vrot.lane.b32.xlu1 %v770_v45, %s2149_s27  ;;  %v2547_v45 = vld [vmem:[%s2204_s22 + $0x54] sm:$0xff]   ;;  %v1232_v42 = vsel %vm1212_vm8, %v1199_v54, %v2523_v31 }
  0xb2   : > { %904 = vrot.lane.b32.xlu0 %v2458_v49, %s2149_s27  ;;  %v2554_v49 = vld [vmem:[%s2204_s22 + $0xbc] ss:$0 sps:$4 sm:$0x11]   ;;  %v591_v17 = vshll.u32 %v2547_v45, 16  ;;  %v589_v59 = vshrl.u32 %v2547_v45, 16  ;;  %v750_v10 = vrot.slane %v2547_v45, 1 }
  0xb3   : > { %v997_v63 = vpop.permute.xlu1 %996  ;;  %v692_v37 = vshll.u32 %v2554_v49, 16 }
  0xb4   : > { %v981_v8 = vpop.permute.xlu0 %980  ;;  %v1263_v33 = vsel %vm1245_vm9, %v1230_v24, %v997_v63  ;;  %v593_v6 = vrot.slane %v591_v17, 1  ;;  %v1117_v17 = vsel %vm1113_vm6, %v1084_v47, %v2469_v55 }
  0xb5   : > { %922 = vrot.lane.b32.xlu1 %v2532_v60, %s2149_s27  ;;  %v1247_v52 = vsel %vm1245_vm9, %v1214_v27, %v981_v8  ;;  %v694_v34 = vrot.slane %v692_v37, 1  ;;  %v1150_v20 = vsel %vm1146_vm5, %v1117_v17, %v2492_v5  ;;  %v775_v37 = vrot.slane %v2554_v49, 1 }
  0xb6   : > { %906 = vrot.lane.b32.xlu0 %v2544_v7, %s2149_s27  ;;  %v594_v8 = vor.u32 %v593_v6, %v589_v59  ;;  %v1183_v22 = vsel %vm1179_vm7, %v1150_v20, %v2508_v25 }
  0xb7   : > { %v999_v15 = vpop.permute.xlu1 %998  ;;  %v695_v62 = vsel %vm503_vm1, %v690_v4, %v694_v34  ;;  %v1216_v57 = vsel %vm1212_vm8, %v1183_v22, %v2528_v61  ;;  %v854_v34 = vrot.slane %v852_v29, 1  ;;  %v893_v22 = vrot.slane %v2115_v53, 1 }
  0xb8   : > { %v983_v30 = vpop.permute.xlu0 %982  ;;  %v1265_v55 = vsel %vm1245_vm9, %v1232_v42, %v999_v15  ;;  %v599_v5 = vsel %vm503_vm1, %v594_v8, %v598_v16 }
  0xb9   : > { %957 = vrot.lane.b32.xlu1 %v2473_v56, %s2150_s28  ;;  %v1249_v31 = vsel %vm1245_vm9, %v1216_v57, %v983_v30  ;;  %v774_v30 = vrot.slane %v2535_v3, 1  ;;  %v2709_v57 = vld [vmem:[%s2390_s14 + $0xc] sm:$0xff]  }
  0xba   : > { %941 = vrot.lane.b32.xlu0 %v2479_v58, %s2150_s28 }
  0xbb   : > { %v1032_v40 = vpop.permute.xlu1 %1031  ;;  %v776_v59 = vsel %vm728_vm0, %v774_v30, %v775_v37  ;;  %v971_v30 = vshll.u32 %v2709_v57, 16 }
  0xbc   : > { %v1296_v41 = vsel %vm1278_vm10, %v1263_v33, %v1032_v40  ;;  %v1016_v18 = vpop.permute.xlu0 %1015  ;;  %v751_v33 = vrot.slane %v2564_v35, 1 }
  0xbd   : > { %959 = vrot.lane.b32.xlu1 %v2535_v3, %s2150_s28  ;;  %2021 = vmatprep.mubr.msk.bf16.mxu1 %vm1331_vm11, %v1296_v41  ;;  %v1280_v63 = vsel %vm1278_vm10, %v1247_v52, %v1016_v18  ;;  %v2116_v18 = vld [vmem:[%s2390_s14 + $0x8] ss:$0 sps:$4 sm:$0x11]  }
  0xbe   : > { %943 = vrot.lane.b32.xlu0 %v2547_v45, %s2150_s28  ;;  %2005 = vmatprep.mubr.msk.bf16.mxu0 %vm1331_vm11, %v1280_v63  ;;  %v752_v27 = vsel %vm728_vm0, %v750_v10, %v751_v33  ;;  %v857_v50 = vshll.u32 %v2116_v18, 16 }
  0xbf   : > { %v2604_v1 = vpop.permute.xlu1 %716 }
  0xc0   : > { %v2614_v19 = vpop.permute.xlu0 %700  ;;  %v859_v8 = vrot.slane %v857_v50, 1 }
  0xc1   : > { %1004 = vrot.lane.b32.xlu1 %v2512_v26, %s2151_s7  ;;  %v1053_v37 = vsel %vm1047_vm3, %v2258_v46, %v2614_v19  ;;  %v969_v46 = vshrl.u32 %v2709_v57, 16 }
  0xc2   : > { %988 = vrot.lane.b32.xlu0 %v2516_v28, %s2151_s7 }
  0xc3   : > { %v1034_v21 = vpop.permute.xlu1 %1033 }
  0xc4   : > { %v1298_v24 = vsel %vm1278_vm10, %v1265_v55, %v1034_v21  ;;  %v1018_v36 = vpop.permute.xlu0 %1017 }
  0xc5   : > { %1006 = vrot.lane.b32.xlu1 %v695_v62, %s2151_s7  ;;  %2022 = vmatmul.mubr.msk.bf16.vlgmr.msra.gmra.mxu1 %vm1331_vm11, %v1298_v24  ;;  %v1282_v25 = vsel %vm1278_vm10, %v1249_v31, %v1018_v36 }
  0xc6   : > { %990 = vrot.lane.b32.xlu0 %v599_v5, %s2151_s7  ;;  %2006 = vmatmul.mubr.msk.bf16.vlgmr.msra.gmra.mxu0 %vm1331_vm11, %v1282_v25  ;;  %v2719_v25 = vld [vmem:[%s2390_s14 + $0x14] ss:$0 sps:$4 sm:$0x11]  }
  0xc7   : > { %v2638_v15 = vpop.permute.xlu1 %718  ;;  %v976_v29 = vshll.u32 %v2719_v25, 16 }
  0xc8   : > { %v2640_v61 = vpop.permute.xlu0 %702 }
  0xc9   : > { %1039 = vrot.lane.b32.xlu1 %v2532_v60, %s2152_s10 }
  0xca   : > { %1023 = vrot.lane.b32.xlu0 %v2544_v7, %s2152_s10 }
  0xcb   : > { %v798_v32 = vpop.permute.xlu1 %797 }
  0xcc   : > { %v2650_v40 = vpop.permute.xlu0 %781 }
  0xcd   : > { %724 = vrot.lane.b32.xlu1 %v2512_v26, %s2147_s25 }
  0xce   : > { %708 = vrot.lane.b32.xlu0 %v2516_v28, %s2147_s25 }
  0xcf   : > { %v2657_v49 = vpop.permute.xlu1 %799 }
  0xd0   : > { %v2660_v41 = vpop.permute.xlu0 %783 }
  0xd1   : > { %1041 = vrot.lane.b32.xlu1 %v776_v59, %s2152_s10 }
  0xd2   : > { %1025 = vrot.lane.b32.xlu0 %v752_v27, %s2152_s10 }
  0xd3   : > { %v835_v35 = vpop.permute.xlu1 %834 }
  0xd4   : > { %v819_v6 = vpop.permute.xlu0 %818 }
  0xd5   : > { %726 = vrot.lane.b32.xlu1 %v695_v62, %s2147_s25 }
  0xd6   : > { %710 = vrot.lane.b32.xlu0 %v599_v5, %s2147_s25 }
  0xd7   : > { %v2666_v26 = vpop.permute.xlu1 %836 }
  0xd8   : > { %v2668_v28 = vpop.permute.xlu0 %820 }
  0xd9   : > { %805 = vrot.lane.b32.xlu1 %v2532_v60, %s2146_s24  ;;  %v850_v60 = vshrl.u32 %v2115_v53, 16 }
  0xda   : > { %789 = vrot.lane.b32.xlu0 %v2544_v7, %s2146_s24 }
  0xdb   : > { %v882_v0 = vpop.permute.xlu1 %881  ;;  %v855_v38 = vor.u32 %v854_v34, %v850_v60  ;;  %v2119_v60 = vld [vmem:[%s2204_s22 + $0x60] sm:$0xff]  }
  0xdc   : > { %v866_v52 = vpop.permute.xlu0 %865 }
  0xdd   : > { %807 = vrot.lane.b32.xlu1 %v776_v59, %s2146_s24  ;;  %v2695_v54 = vsel %vm503_vm1, %v855_v38, %v859_v8 }
  0xde   : > { %791 = vrot.lane.b32.xlu0 %v752_v27, %s2146_s24  ;;  %s2891_s24 = scalar_lea.vmem %s3001_s4, %s1947_s21 }
  0xdf   : > { %v2678_v63 = vpop.permute.xlu1 %883 }
  0xe0   : > { %v2680_v4 = vpop.permute.xlu0 %867 }
  0xe1   : > { %842 = vrot.lane.b32.xlu1 %v2535_v3, %s2145_s23 }
  0xe2   : > { %826 = vrot.lane.b32.xlu0 %v2547_v45, %s2145_s23 }
  0xe3   : > { %v917_v7 = vpop.permute.xlu1 %916 }
  0xe4   : > { %v901_v47 = vpop.permute.xlu0 %900 }
  0xe5   : > { %844 = vrot.lane.b32.xlu1 %v2115_v53, %s2145_s23 }
  0xe6   : > { %828 = vrot.lane.b32.xlu0 %v2217_v2, %s2145_s23  ;;  %v894_v2 = vrot.slane %v2116_v18, 1  ;;  %v973_v18 = vrot.slane %v971_v30, 1  ;;  %v1013_v30 = vrot.slane %v2719_v25, 1 }
  0xe7   : > { %v2689_v16 = vpop.permute.xlu1 %918 }
  0xe8   : > { %v2691_v17 = vpop.permute.xlu0 %902  ;;  %v974_v8 = vor.u32 %v973_v18, %v969_v46 }
  0xe9   : > { %889 = vrot.lane.b32.xlu1 %v695_v62, %s2148_s26  ;;  %v2706_v62 = vsel %vm728_vm0, %v893_v22, %v894_v2 }
  0xea   : > { %873 = vrot.lane.b32.xlu0 %v599_v5, %s2148_s26  ;;  %v1069_v5 = vsel %vm1047_vm3, %v2252_v39, %v2604_v1  ;;  %v1086_v1 = vsel %vm1080_vm4, %v1053_v37, %v2650_v40 }
  0xeb   : > { %v954_v20 = vpop.permute.xlu1 %953  ;;  %v1102_v36 = vsel %vm1080_vm4, %v1069_v5, %v798_v32  ;;  %v1119_v33 = vsel %vm1113_vm6, %v1086_v1, %v819_v6 }
  0xec   : > { %v938_v42 = vpop.permute.xlu0 %937  ;;  %v1135_v10 = vsel %vm1113_vm6, %v1102_v36, %v835_v35  ;;  %v1152_v19 = vsel %vm1146_vm5, %v1119_v33, %v866_v52  ;;  %v1071_v52 = vsel %vm1047_vm3, %v2303_v11, %v2638_v15  ;;  %v2120_v15 = vld [vmem:[%s2204_s22 + $0x6c] sm:$0xff]  }
  0xed   : > { %891 = vrot.lane.b32.xlu1 %v2695_v54, %s2148_s26  ;;  %v1168_v32 = vsel %vm1146_vm5, %v1135_v10, %v882_v0  ;;  %v1185_v40 = vsel %vm1179_vm7, %v1152_v19, %v901_v47  ;;  %v1104_v47 = vsel %vm1080_vm4, %v1071_v52, %v2657_v49 }
  0xee   : > { %875 = vrot.lane.b32.xlu0 %v2268_v51, %s2148_s26  ;;  %v1137_v11 = vsel %vm1113_vm6, %v1104_v47, %v2666_v26 }
  0xef   : > { %v956_v55 = vpop.permute.xlu1 %955  ;;  %v1170_v2 = vsel %vm1146_vm5, %v1137_v11, %v2678_v63 }
  0xf0   : > { %v2702_v21 = vpop.permute.xlu0 %939 }
  0xf1   : > { %924 = vrot.lane.b32.xlu1 %v776_v59, %s2149_s27  ;;  %v1201_v59 = vsel %vm1179_vm7, %v1168_v32, %v917_v7 }
  0xf2   : > { %908 = vrot.lane.b32.xlu0 %v752_v27, %s2149_s27  ;;  %v1234_v35 = vsel %vm1212_vm8, %v1201_v59, %v954_v20  ;;  %v978_v20 = vrot.slane %v976_v29, 1 }
  0xf3   : > { %v1001_v24 = vpop.permute.xlu1 %1000 }
  0xf4   : > { %v985_v31 = vpop.permute.xlu0 %984  ;;  %v1267_v0 = vsel %vm1245_vm9, %v1234_v35, %v1001_v24 }
  0xf5   : > { %926 = vrot.lane.b32.xlu1 %v2706_v62, %s2149_s27 }
  0xf6   : > { %910 = vrot.lane.b32.xlu0 %v2230_v12, %s2149_s27 }
  0xf7   : > { %v1003_v39 = vpop.permute.xlu1 %1002 }
  0xf8   : > { %v987_v27 = vpop.permute.xlu0 %986 }
  0xf9   : > { %961 = vrot.lane.b32.xlu1 %v2115_v53, %s2150_s28  ;;  %v1218_v53 = vsel %vm1212_vm8, %v1185_v40, %v938_v42  ;;  %v1055_v42 = vsel %vm1047_vm3, %v2310_v14, %v2640_v61  ;;  %v1203_v14 = vsel %vm1179_vm7, %v1170_v2, %v2689_v16 }
  0xfa   : > { %945 = vrot.lane.b32.xlu0 %v2119_v60, %s2150_s28  ;;  %v1251_v50 = vsel %vm1245_vm9, %v1218_v53, %v985_v31  ;;  %v1088_v49 = vsel %vm1080_vm4, %v1055_v42, %v2660_v41  ;;  %v1236_v5 = vsel %vm1212_vm8, %v1203_v14, %v956_v55  ;;  %v979_v41 = vsel %vm503_vm1, %v974_v8, %v978_v20 }
  0xfb   : > { %v1036_v6 = vpop.permute.xlu1 %1035  ;;  %v1121_v24 = vsel %vm1113_vm6, %v1088_v49, %v2668_v28  ;;  %v1269_v31 = vsel %vm1245_vm9, %v1236_v5, %v1003_v39  ;;  %v1012_v55 = vrot.slane %v2709_v57, 1 }
  0xfc   : > { %v1300_v34 = vsel %vm1278_vm10, %v1267_v0, %v1036_v6  ;;  %v1020_v7 = vpop.permute.xlu0 %1019  ;;  %v1154_v26 = vsel %vm1146_vm5, %v1121_v24, %v2680_v4 }
  0xfd   : > { %963 = vrot.lane.b32.xlu1 %v2709_v57, %s2150_s28  ;;  %2025 = vmatprep.mubr.msk.bf16.mxu1 %vm1331_vm11, %v1300_v34  ;;  %v1284_v38 = vsel %vm1278_vm10, %v1251_v50, %v1020_v7  ;;  %v1187_v63 = vsel %vm1179_vm7, %v1154_v26, %v2691_v17  ;;  %v1014_v37 = vsel %vm728_vm0, %v1012_v55, %v1013_v30 }
  0xfe   : > { %947 = vrot.lane.b32.xlu0 %v2120_v15, %s2150_s28  ;;  %2009 = vmatprep.mubr.msk.bf16.mxu0 %vm1331_vm11, %v1284_v38  ;;  %v1220_v16 = vsel %vm1212_vm8, %v1187_v63, %v2702_v21 }
  0xff   : > { %v721_v22 = vpop.permute.xlu1 %720  ;;  %v1253_v4 = vsel %vm1245_vm9, %v1220_v16, %v987_v27 }
 0x100   : > { %v705_v61 = vpop.permute.xlu0 %704 }
 0x101   : > { %1008 = vrot.lane.b32.xlu1 %v2695_v54, %s2151_s7  ;;  %v1057_v52 = vsel %vm1047_vm3, %v2371_v44, %v705_v61 }
 0x102   : > { %992 = vrot.lane.b32.xlu0 %v2268_v51, %s2151_s7 }
 0x103   : > { %v1038_v28 = vpop.permute.xlu1 %1037 }
 0x104   : > { %v1302_v54 = vsel %vm1278_vm10, %v1269_v31, %v1038_v28  ;;  %v1022_v36 = vpop.permute.xlu0 %1021 }
 0x105   : > { %1010 = vrot.lane.b32.xlu1 %v979_v41, %s2151_s7  ;;  %2026 = vmatmul.mubr.msk.bf16.gmra.mxu1 %vm1331_vm11, %v1302_v54  ;;  %v1286_v17 = vsel %vm1278_vm10, %v1253_v4, %v1022_v36 }
 0x106   : > { %994 = vrot.lane.b32.xlu0 %v2263_v48, %s2151_s7  ;;  %2010 = vmatmul.mubr.msk.bf16.gmra.mxu0 %vm1331_vm11, %v1286_v17 }
 0x107   : > { %v723_v51 = vpop.permute.xlu1 %722 }
 0x108   : > { %v707_v21 = vpop.permute.xlu0 %706  ;;  %v1075_v24 = vsel %vm1047_vm3, %v2407_v9, %v723_v51 }
 0x109   : > { %1043 = vrot.lane.b32.xlu1 %v2706_v62, %s2152_s10  ;;  %v1059_v41 = vsel %vm1047_vm3, %v2412_v13, %v707_v21 }
 0x10a   : > { %1027 = vrot.lane.b32.xlu0 %v2230_v12, %s2152_s10 }
 0x10b   : > { %v802_v10 = vpop.permute.xlu1 %801 }
 0x10c   : > { %v786_v39 = vpop.permute.xlu0 %785 }
 0x10d   : > { %1045 = vrot.lane.b32.xlu1 %v1014_v37, %s2152_s10  ;;  %v1090_v47 = vsel %vm1080_vm4, %v1057_v52, %v786_v39 }
 0x10e   : > { %1029 = vrot.lane.b32.xlu0 %v2242_v23, %s2152_s10  ;;  %v1073_v23 = vsel %vm1047_vm3, %v2366_v43, %v721_v22 }
 0x10f   : > { %v804_v48 = vpop.permute.xlu1 %803  ;;  %v1106_v34 = vsel %vm1080_vm4, %v1073_v23, %v802_v10 }
 0x110   : > { %v788_v57 = vpop.permute.xlu0 %787  ;;  %v1108_v26 = vsel %vm1080_vm4, %v1075_v24, %v804_v48 }
 0x111   : > { %v1092_v28 = vsel %vm1080_vm4, %v1059_v41, %v788_v57 }
 0x113   : > { %v839_v25 = vpop.permute.xlu1 %838 }
 0x114   : > { %v823_v1 = vpop.permute.xlu0 %822  ;;  %v1139_v50 = vsel %vm1113_vm6, %v1106_v34, %v839_v25 }
 0x115   : > { %v1123_v8 = vsel %vm1113_vm6, %v1090_v47, %v823_v1 }
 0x117   : > { %v841_v32 = vpop.permute.xlu1 %840 }
 0x118   : > { %v825_v33 = vpop.permute.xlu0 %824  ;;  %v1141_v63 = vsel %vm1113_vm6, %v1108_v26, %v841_v32 }
 0x119   : > { %v1125_v16 = vsel %vm1113_vm6, %v1092_v28, %v825_v33 }
 0x11b   : > { %v886_v59 = vpop.permute.xlu1 %885 }
 0x11c   : > { %v870_v62 = vpop.permute.xlu0 %869  ;;  %v1172_v38 = vsel %vm1146_vm5, %v1139_v50, %v886_v59 }
 0x11d   : > { %v1156_v43 = vsel %vm1146_vm5, %v1123_v8, %v870_v62 }
 0x11f   : > { %v888_v27 = vpop.permute.xlu1 %887 }
 0x120   : > { %v872_v46 = vpop.permute.xlu0 %871  ;;  %v1174_v9 = vsel %vm1146_vm5, %v1141_v63, %v888_v27 }
 0x121   : > { %v1158_v36 = vsel %vm1146_vm5, %v1125_v16, %v872_v46 }
 0x123   : > { %v921_v19 = vpop.permute.xlu1 %920 }
 0x124   : > { %v905_v35 = vpop.permute.xlu0 %904  ;;  %v1205_v20 = vsel %vm1179_vm7, %v1172_v38, %v921_v19 }
 0x125   : > { %v1189_v15 = vsel %vm1179_vm7, %v1156_v43, %v905_v35 }
 0x127   : > { %v923_v12 = vpop.permute.xlu1 %922 }
 0x128   : > { %v907_v18 = vpop.permute.xlu0 %906  ;;  %v1207_v54 = vsel %vm1179_vm7, %v1174_v9, %v923_v12 }
 0x129   : > { %v1191_v13 = vsel %vm1179_vm7, %v1158_v36, %v907_v18 }
 0x12b   : > { %v958_v29 = vpop.permute.xlu1 %957 }
 0x12c   : > { %v942_v40 = vpop.permute.xlu0 %941  ;;  %v1238_v11 = vsel %vm1212_vm8, %v1205_v20, %v958_v29 }
 0x12d   : > { %v1222_v49 = vsel %vm1212_vm8, %v1189_v15, %v942_v40 }
 0x12f   : > { %v960_v0 = vpop.permute.xlu1 %959 }
 0x130   : > { %v944_v60 = vpop.permute.xlu0 %943  ;;  %v1240_v17 = vsel %vm1212_vm8, %v1207_v54, %v960_v0 }
 0x131   : > { %v1224_v51 = vsel %vm1212_vm8, %v1191_v13, %v944_v60 }
 0x133   : > { %v1005_v6 = vpop.permute.xlu1 %1004 }
 0x134   : > { %v989_v53 = vpop.permute.xlu0 %988  ;;  %v1271_v44 = vsel %vm1245_vm9, %v1238_v11, %v1005_v6 }
 0x135   : > { %v1255_v14 = vsel %vm1245_vm9, %v1222_v49, %v989_v53 }
 0x137   : > { %v1007_v7 = vpop.permute.xlu1 %1006 }
 0x138   : > { %v991_v42 = vpop.permute.xlu0 %990  ;;  %v1273_v55 = vsel %vm1245_vm9, %v1240_v17, %v1007_v7 }
 0x139   : > { %v1257_v37 = vsel %vm1245_vm9, %v1224_v51, %v991_v42 }
 0x13b   : > { %v1040_v22 = vpop.permute.xlu1 %1039 }
 0x13c   : > { %v1304_v2 = vsel %vm1278_vm10, %v1271_v44, %v1040_v22  ;;  %v1024_v61 = vpop.permute.xlu0 %1023 }
 0x13d   : > { %2029 = vmatprep.mubr.msk.bf16.mxu1 %vm1331_vm11, %v1304_v2  ;;  %v1288_v5 = vsel %vm1278_vm10, %v1255_v14, %v1024_v61 }
 0x13e   : > { %2013 = vmatprep.mubr.msk.bf16.mxu0 %vm1331_vm11, %v1288_v5 }
 0x13f   : > { %v725_v31 = vpop.permute.xlu1 %724 }
 0x140   : > { %v709_v4 = vpop.permute.xlu0 %708  ;;  %v1077_v50 = vsel %vm1047_vm3, %v2473_v56, %v725_v31 }
 0x141   : > { %v1061_v38 = vsel %vm1047_vm3, %v2479_v58, %v709_v4 }
 0x143   : > { %v1042_v30 = vpop.permute.xlu1 %1041 }
 0x144   : > { %v1306_v21 = vsel %vm1278_vm10, %v1273_v55, %v1042_v30  ;;  %v1026_v10 = vpop.permute.xlu0 %1025 }
 0x145   : > { %2030 = vmatmul.mubr.msk.bf16.gmra.mxu1 %vm1331_vm11, %v1306_v21  ;;  %v1290_v39 = vsel %vm1278_vm10, %v1257_v37, %v1026_v10  ;;  %v2884_v10 = vld [vmem:[%s3000_s3] ss:$0 sm:$0xff] }
 0x146   : > { %2014 = vmatmul.mubr.msk.bf16.gmra.mxu0 %vm1331_vm11, %v1290_v39 }
 0x147   : > { %v727_v48 = vpop.permute.xlu1 %726 }
 0x148   : > { %v711_v57 = vpop.permute.xlu0 %710  ;;  %v1079_v11 = vsel %vm1047_vm3, %v2535_v3, %v727_v48 }
 0x149   : > { %v1063_v2 = vsel %vm1047_vm3, %v2547_v45, %v711_v57 }
 0x14b   : > { %v806_v25 = vpop.permute.xlu1 %805 }
 0x14c   : > { %v790_v1 = vpop.permute.xlu0 %789  ;;  %v1110_v47 = vsel %vm1080_vm4, %v1077_v50, %v806_v25 }
 0x14d   : > { %v1094_v42 = vsel %vm1080_vm4, %v1061_v38, %v790_v1 }
 0x14f   : > { %v808_v32 = vpop.permute.xlu1 %807 }
 0x150   : > { %v792_v33 = vpop.permute.xlu0 %791  ;;  %v1112_v22 = vsel %vm1080_vm4, %v1079_v11, %v808_v32 }
 0x151   : > { %v1096_v26 = vsel %vm1080_vm4, %v1063_v2, %v792_v33 }
 0x153   : > { %v843_v59 = vpop.permute.xlu1 %842 }
 0x154   : > { %v827_v62 = vpop.permute.xlu0 %826  ;;  %v1143_v8 = vsel %vm1113_vm6, %v1110_v47, %v843_v59 }
 0x155   : > { %v1127_v15 = vsel %vm1113_vm6, %v1094_v42, %v827_v62 }
 0x157   : > { %v845_v27 = vpop.permute.xlu1 %844 }
 0x158   : > { %v829_v46 = vpop.permute.xlu0 %828  ;;  %v1145_v24 = vsel %vm1113_vm6, %v1112_v22, %v845_v27 }
 0x159   : > { %v1129_v31 = vsel %vm1113_vm6, %v1096_v26, %v829_v46 }
 0x15b   : > { %v890_v19 = vpop.permute.xlu1 %889 }
 0x15c   : > { %v874_v35 = vpop.permute.xlu0 %873  ;;  %v1176_v43 = vsel %vm1146_vm5, %v1143_v8, %v890_v19 }
 0x15d   : > { %v1160_v49 = vsel %vm1146_vm5, %v1127_v15, %v874_v35 }
 0x15f   : > { %v892_v12 = vpop.permute.xlu1 %891 }
 0x160   : > { %v876_v18 = vpop.permute.xlu0 %875  ;;  %v1178_v5 = vsel %vm1146_vm5, %v1145_v24, %v892_v12 }
 0x161   : > { %v1162_v16 = vsel %vm1146_vm5, %v1129_v31, %v876_v18 }
 0x163   : > { %v925_v29 = vpop.permute.xlu1 %924 }
 0x164   : > { %v909_v40 = vpop.permute.xlu0 %908  ;;  %v1209_v56 = vsel %vm1179_vm7, %v1176_v43, %v925_v29 }
 0x165   : > { %v1193_v14 = vsel %vm1179_vm7, %v1160_v49, %v909_v40 }
 0x167   : > { %v927_v0 = vpop.permute.xlu1 %926 }
 0x168   : > { %v911_v60 = vpop.permute.xlu0 %910  ;;  %v1211_v28 = vsel %vm1179_vm7, %v1178_v5, %v927_v0 }
 0x169   : > { %v1195_v36 = vsel %vm1179_vm7, %v1162_v16, %v911_v60 }
 0x16b   : > { %v962_v6 = vpop.permute.xlu1 %961 }
 0x16c   : > { %v946_v23 = vpop.permute.xlu0 %945  ;;  %v1242_v58 = vsel %vm1212_vm8, %v1209_v56, %v962_v6 }
 0x16d   : > { %v1226_v41 = vsel %vm1212_vm8, %v1193_v14, %v946_v23 }
 0x16f   : > { %v964_v53 = vpop.permute.xlu1 %963 }
 0x170   : > { %v948_v34 = vpop.permute.xlu0 %947  ;;  %v1244_v54 = vsel %vm1212_vm8, %v1211_v28, %v964_v53 }
 0x171   : > { %v1228_v55 = vsel %vm1212_vm8, %v1195_v36, %v948_v34 }
 0x173   : > { %v1009_v52 = vpop.permute.xlu1 %1008 }
 0x174   : > { %v993_v7 = vpop.permute.xlu0 %992  ;;  %v1275_v3 = vsel %vm1245_vm9, %v1242_v58, %v1009_v52 }
 0x175   : > { %v1259_v45 = vsel %vm1245_vm9, %v1226_v41, %v993_v7 }
 0x177   : > { %v1011_v20 = vpop.permute.xlu1 %1010 }
 0x178   : > { %v995_v44 = vpop.permute.xlu0 %994  ;;  %v1277_v17 = vsel %vm1245_vm9, %v1244_v54, %v1011_v20 }
 0x179   : > { %v1261_v51 = vsel %vm1245_vm9, %v1228_v55, %v995_v44 }
 0x17b   : > { %v1044_v61 = vpop.permute.xlu1 %1043 }
 0x17c   : > { %v1308_v63 = vsel %vm1278_vm10, %v1275_v3, %v1044_v61  ;;  %v1028_v9 = vpop.permute.xlu0 %1027 }
 0x17d   : > { %2033 = vmatprep.mubr.msk.bf16.mxu1 %vm1331_vm11, %v1308_v63  ;;  %v1292_v4 = vsel %vm1278_vm10, %v1259_v45, %v1028_v9 }
 0x17e   : > { %2017 = vmatprep.mubr.msk.bf16.mxu0 %vm1331_vm11, %v1292_v4 }
 0x17f   : > { %v1046_v13 = vpop.permute.xlu1 %1045 }
 0x180   : > { %v1310_v30 = vsel %vm1278_vm10, %v1277_v17, %v1046_v13  ;;  %v1030_v21 = vpop.permute.xlu0 %1029 }
 0x181   : > { %2034 = vmatmul.mubr.msk.bf16.gmra.mxu1 %vm1331_vm11, %v1310_v30  ;;  %v1294_v37 = vsel %vm1278_vm10, %v1261_v51, %v1030_v21 }
 0x182   : > { %2018 = vmatmul.mubr.msk.bf16.gmra.mxu0 %vm1331_vm11, %v1294_v37 }
 0x185   : > { %v2023_v39 = vpop.f32.mrf.mxu1 }
 0x186   : > { %v1554_v48 = vadd.f32 %v2023_v39, %v2884_v10  ;;  %v2007_v57 = vpop.f32.mrf.mxu0 }
 0x187   : > { %v1466_v25 = vpop.f32.mrf.mxu1  ;;  %v1538_v1 = vadd.f32 %v2007_v57, %v2884_v10 }
 0x188   : > { %v1966_v32 = vpack.c.bf16 %v1554_v48, %v1554_v48  ;;  %v1552_v33 = vadd.f32 %v2884_v10, %v1466_v25  ;;  %v1402_v59 = vpop.f32.mrf.mxu0 }
 0x189   : > { %v2024_v62 = vpop.f32.mrf.mxu1  ;;  %v1950_v27 = vpack.c.bf16 %v1538_v1, %v1538_v1  ;;  %v1536_v46 = vadd.f32 %v2884_v10, %v1402_v59 }
 0x18a   : > { %1715 = vst.msk [vmem:[%s2891_s24 + $0x48] sm:$0xf] %vm1696_vm12, %v1966_v32  ;;  %v1964_v19 = vpack.c.bf16 %v1552_v33, %v1552_v33  ;;  %v1555_v35 = vadd.f32 %v2024_v62, %v2884_v10  ;;  %v2008_v12 = vpop.f32.mrf.mxu0 }
 0x18b   : > { %v1469_v18 = vpop.f32.mrf.mxu1  ;;  %1699 = vst.msk [vmem:[%s2891_s24 + $0x8] sm:$0xf] %vm1696_vm12, %v1950_v27  ;;  %v1948_v29 = vpack.c.bf16 %v1536_v46, %v1536_v46  ;;  %v1539_v40 = vadd.f32 %v2008_v12, %v2884_v10 }
 0x18c   : > { %1713 = vst.msk [vmem:[%s2891_s24 + $0x40] sm:$0xf] %vm1696_vm12, %v1964_v19  ;;  %v1967_v0 = vpack.c.bf16 %v1555_v35, %v1555_v35  ;;  %v1553_v60 = vadd.f32 %v2884_v10, %v1469_v18  ;;  %v1405_v6 = vpop.f32.mrf.mxu0 }
 0x18d   : > { %1697 = vst.msk [vmem:[%s2891_s24] sm:$0xf] %vm1696_vm12, %v1948_v29  ;;  %v1951_v23 = vpack.c.bf16 %v1539_v40, %v1539_v40  ;;  %v1537_v53 = vadd.f32 %v2884_v10, %v1405_v6 }
 0x18e   : > { %1716 = vst.msk [vmem:[%s2891_s24 + $0x4c] sm:$0xf] %vm1696_vm12, %v1967_v0  ;;  %v1965_v34 = vpack.c.bf16 %v1553_v60, %v1553_v60 }
 0x18f   : > { %1700 = vst.msk [vmem:[%s2891_s24 + $0xc] sm:$0xf] %vm1696_vm12, %v1951_v23  ;;  %v1949_v52 = vpack.c.bf16 %v1537_v53, %v1537_v53 }
 0x190   : > { %1714 = vst.msk [vmem:[%s2891_s24 + $0x44] sm:$0xf] %vm1696_vm12, %v1965_v34 }
 0x191   : > { %1698 = vst.msk [vmem:[%s2891_s24 + $0x4] sm:$0xf] %vm1696_vm12, %v1949_v52 }
 0x1c5   : > { %v2027_v50 = vpop.f32.mrf.mxu1 }
 0x1c6   : > { %v1558_v7 = vadd.f32 %v2027_v50, %v2884_v10  ;;  %v2011_v47 = vpop.f32.mrf.mxu0 }
 0x1c7   : > { %v1482_v38 = vpop.f32.mrf.mxu1  ;;  %v1542_v8 = vadd.f32 %v2011_v47, %v2884_v10 }
 0x1c8   : > { %v1970_v20 = vpack.c.bf16 %v1558_v7, %v1558_v7  ;;  %v1556_v42 = vadd.f32 %v2884_v10, %v1482_v38  ;;  %v1418_v43 = vpop.f32.mrf.mxu0 }
 0x1c9   : > { %v2028_v11 = vpop.f32.mrf.mxu1  ;;  %v1954_v15 = vpack.c.bf16 %v1542_v8, %v1542_v8  ;;  %v1540_v56 = vadd.f32 %v2884_v10, %v1418_v43 }
 0x1ca   : > { %1719 = vst.msk [vmem:[%s2891_s24 + $0x58] sm:$0xf] %vm1696_vm12, %v1970_v20  ;;  %v1968_v44 = vpack.c.bf16 %v1556_v42, %v1556_v42  ;;  %v1559_v22 = vadd.f32 %v2028_v11, %v2884_v10  ;;  %v2012_v49 = vpop.f32.mrf.mxu0 }
 0x1cb   : > { %v1485_v58 = vpop.f32.mrf.mxu1  ;;  %1703 = vst.msk [vmem:[%s2891_s24 + $0x18] sm:$0xf] %vm1696_vm12, %v1954_v15  ;;  %v1952_v2 = vpack.c.bf16 %v1540_v56, %v1540_v56  ;;  %v1543_v24 = vadd.f32 %v2012_v49, %v2884_v10 }
 0x1cc   : > { %1717 = vst.msk [vmem:[%s2891_s24 + $0x50] sm:$0xf] %vm1696_vm12, %v1968_v44  ;;  %v1971_v14 = vpack.c.bf16 %v1559_v22, %v1559_v22  ;;  %v1557_v3 = vadd.f32 %v2884_v10, %v1485_v58  ;;  %v1421_v61 = vpop.f32.mrf.mxu0 }
 0x1cd   : > { %1701 = vst.msk [vmem:[%s2891_s24 + $0x10] sm:$0xf] %vm1696_vm12, %v1952_v2  ;;  %v1955_v26 = vpack.c.bf16 %v1543_v24, %v1543_v24  ;;  %v1541_v5 = vadd.f32 %v2884_v10, %v1421_v61 }
 0x1ce   : > { %1720 = vst.msk [vmem:[%s2891_s24 + $0x5c] sm:$0xf] %vm1696_vm12, %v1971_v14  ;;  %v1969_v41 = vpack.c.bf16 %v1557_v3, %v1557_v3 }
 0x1cf   : > { %1704 = vst.msk [vmem:[%s2891_s24 + $0x1c] sm:$0xf] %vm1696_vm12, %v1955_v26  ;;  %v1953_v63 = vpack.c.bf16 %v1541_v5, %v1541_v5 }
 0x1d0   : > { %1718 = vst.msk [vmem:[%s2891_s24 + $0x54] sm:$0xf] %vm1696_vm12, %v1969_v41 }
 0x1d1   : > { %1702 = vst.msk [vmem:[%s2891_s24 + $0x14] sm:$0xf] %vm1696_vm12, %v1953_v63 }
 0x205   : > { %v2031_v31 = vpop.f32.mrf.mxu1 }
 0x206   : > { %v1562_v28 = vadd.f32 %v2031_v31, %v2884_v10  ;;  %v2015_v45 = vpop.f32.mrf.mxu0 }
 0x207   : > { %v1498_v9 = vpop.f32.mrf.mxu1  ;;  %v1546_v16 = vadd.f32 %v2015_v45, %v2884_v10 }
 0x208   : > { %v1974_v54 = vpack.c.bf16 %v1562_v28, %v1562_v28  ;;  %v1560_v4 = vadd.f32 %v2884_v10, %v1498_v9  ;;  %v1434_v36 = vpop.f32.mrf.mxu0 }
 0x209   : > { %v2032_v17 = vpop.f32.mrf.mxu1  ;;  %v1958_v13 = vpack.c.bf16 %v1546_v16, %v1546_v16  ;;  %v1544_v55 = vadd.f32 %v2884_v10, %v1434_v36 }
 0x20a   : > { %1723 = vst.msk [vmem:[%s2891_s24 + $0x68] sm:$0xf] %vm1696_vm12, %v1974_v54  ;;  %v1972_v30 = vpack.c.bf16 %v1560_v4, %v1560_v4  ;;  %v1563_v51 = vadd.f32 %v2032_v17, %v2884_v10  ;;  %v2016_v21 = vpop.f32.mrf.mxu0 }
 0x20b   : > { %v1501_v37 = vpop.f32.mrf.mxu1  ;;  %1707 = vst.msk [vmem:[%s2891_s24 + $0x28] sm:$0xf] %vm1696_vm12, %v1958_v13  ;;  %v1956_v39 = vpack.c.bf16 %v1544_v55, %v1544_v55  ;;  %v1547_v48 = vadd.f32 %v2016_v21, %v2884_v10 }
 0x20c   : > { %1721 = vst.msk [vmem:[%s2891_s24 + $0x60] sm:$0xf] %vm1696_vm12, %v1972_v30  ;;  %v1975_v57 = vpack.c.bf16 %v1563_v51, %v1563_v51  ;;  %v1561_v25 = vadd.f32 %v2884_v10, %v1501_v37  ;;  %v1437_v1 = vpop.f32.mrf.mxu0 }
 0x20d   : > { %1705 = vst.msk [vmem:[%s2891_s24 + $0x20] sm:$0xf] %vm1696_vm12, %v1956_v39  ;;  %v1959_v32 = vpack.c.bf16 %v1547_v48, %v1547_v48  ;;  %v1545_v33 = vadd.f32 %v2884_v10, %v1437_v1 }
 0x20e   : > { %1724 = vst.msk [vmem:[%s2891_s24 + $0x6c] sm:$0xf] %vm1696_vm12, %v1975_v57  ;;  %v1973_v59 = vpack.c.bf16 %v1561_v25, %v1561_v25 }
 0x20f   : > { %1708 = vst.msk [vmem:[%s2891_s24 + $0x2c] sm:$0xf] %vm1696_vm12, %v1959_v32  ;;  %v1957_v62 = vpack.c.bf16 %v1545_v33, %v1545_v33 }
 0x210   : > { %1722 = vst.msk [vmem:[%s2891_s24 + $0x64] sm:$0xf] %vm1696_vm12, %v1973_v59 }
 0x211   : > { %1706 = vst.msk [vmem:[%s2891_s24 + $0x24] sm:$0xf] %vm1696_vm12, %v1957_v62 }
 0x241   : > { %v2035_v27 = vpop.f32.mrf.mxu1 }
 0x242   : > { %v1566_v46 = vadd.f32 %v2035_v27, %v2884_v10  ;;  %v2019_v19 = vpop.f32.mrf.mxu0 }
 0x243   : > { %v1514_v35 = vpop.f32.mrf.mxu1  ;;  %v1550_v12 = vadd.f32 %v2019_v19, %v2884_v10 }
 0x244   : > { %v1978_v18 = vpack.c.bf16 %v1566_v46, %v1566_v46  ;;  %v1564_v29 = vadd.f32 %v2884_v10, %v1514_v35  ;;  %v1450_v40 = vpop.f32.mrf.mxu0 }
 0x245   : > { %v2036_v0 = vpop.f32.mrf.mxu1  ;;  %v1962_v60 = vpack.c.bf16 %v1550_v12, %v1550_v12  ;;  %v1548_v6 = vadd.f32 %v2884_v10, %v1450_v40 }
 0x246   : > { %1727 = vst.msk [vmem:[%s2891_s24 + $0x78] sm:$0xf] %vm1696_vm12, %v1978_v18  ;;  %v1976_v23 = vpack.c.bf16 %v1564_v29, %v1564_v29  ;;  %v1567_v53 = vadd.f32 %v2036_v0, %v2884_v10  ;;  %v2020_v34 = vpop.f32.mrf.mxu0 }
 0x247   : > { %v1517_v52 = vpop.f32.mrf.mxu1  ;;  %1711 = vst.msk [vmem:[%s2891_s24 + $0x38] sm:$0xf] %vm1696_vm12, %v1962_v60  ;;  %v1960_v50 = vpack.c.bf16 %v1548_v6, %v1548_v6  ;;  %v1551_v7 = vadd.f32 %v2020_v34, %v2884_v10 }
 0x248   : > { %1725 = vst.msk [vmem:[%s2891_s24 + $0x70] sm:$0xf] %vm1696_vm12, %v1976_v23  ;;  %v1979_v47 = vpack.c.bf16 %v1567_v53, %v1567_v53  ;;  %v1565_v38 = vadd.f32 %v2884_v10, %v1517_v52  ;;  %v1453_v8 = vpop.f32.mrf.mxu0 }
 0x249   : > { %1709 = vst.msk [vmem:[%s2891_s24 + $0x30] sm:$0xf] %vm1696_vm12, %v1960_v50  ;;  %v1963_v20 = vpack.c.bf16 %v1551_v7, %v1551_v7  ;;  %v1549_v42 = vadd.f32 %v2884_v10, %v1453_v8 }
 0x24a   : > { %1728 = vst.msk [vmem:[%s2891_s24 + $0x7c] sm:$0xf] %vm1696_vm12, %v1979_v47  ;;  %v1977_v43 = vpack.c.bf16 %v1565_v38, %v1565_v38 }
 0x24b   : > { %1712 = vst.msk [vmem:[%s2891_s24 + $0x3c] sm:$0xf] %vm1696_vm12, %v1963_v20  ;;  %v1961_v11 = vpack.c.bf16 %v1549_v42, %v1549_v42 }
 0x24c   : > { %1726 = vst.msk [vmem:[%s2891_s24 + $0x74] sm:$0xf] %vm1696_vm12, %v1977_v43 }
 0x24d   : > { %1710 = vst.msk [vmem:[%s2891_s24 + $0x34] sm:$0xf] %vm1696_vm12, %v1961_v11 }
 0x24e PF: > { %s14_s17 = sadd.s32 1, %s2143_s17   ;;  %s3002_s15 = smov %s2139_s16 }
 0x24f   : > { %p11_p5 = scmp.ge.s32.totalorder %s14_s17, 4   ;;  %s3003_s16 = smov %s3005_s18 }
 0x251   :  { %13 = sbr.rel (!%p11_p5) target bundleno = 2 (0x2), region = 69 }

</bundles_post_ra>
